<compile_context>
chip_gen: v7x
topology: tpu7x:2x2x1
jax: 0.10.0
libtpu: 0.0.40
codegen_flags: <defaults>
</compile_context>

<pallas_src>
import jax
import jax.numpy as jnp
from jax.experimental import pallas as pl
from jax.experimental.pallas import tpu as pltpu

# ---- hyperparameters (small, consistent with the module) ----
MaxPos = 16
dimWPE = 8
VOCAB = 50
EMB_DIM = 32
HIDDEN = 32
NLAYERS = 2
B = 2
T = 8
E_IN = EMB_DIM + 2 * dimWPE          # GRU input size = emb_dim + 2*dimWPE = 48
# bidir=False case of the module (num_directions == 1)


# ------------------------- fused Pallas kernel -------------------------

def _make_fused_encoder_kernel(nlayers, seq_len, batch, hidden):
    """Builds a kernel taking:
       x (T*B, E), [w_ih^T (E_l,3H), w_hh^T (H,3H), b_ih (1,3H), b_hh (1,3H)] * nlayers,
       en2de W^T (H,H), en2de b (1,H)  ->  out (B, H)
       scratch: seq (T*B, H) f32 holding the inter-layer sequence in VMEM."""
    T_, B_, H = seq_len, batch, hidden

    def kernel(*refs):
        x_ref = refs[0]
        layer_refs = refs[1:1 + 4 * nlayers]
        wde_ref = refs[1 + 4 * nlayers]
        bde_ref = refs[2 + 4 * nlayers]
        out_ref = refs[3 + 4 * nlayers]
        seq_sc = refs[4 + 4 * nlayers]

        def run_recurrence(gi_all, whh_ref, bhh_ref, write_seq):
            # gi_all: (T*B, 3H) hoisted input projection (value, stays in vregs).
            whh = whh_ref[...]                                    # (H, 3H), hoisted
            bhh = jnp.broadcast_to(bhh_ref[...], (B_, 3 * H))     # hoisted broadcast
            h = jnp.zeros((B_, H), jnp.float32)                   # h0 = zeros
            # T_ is a static int -> loop is fully unrolled; all slices are static.
            for t in range(T_):
                gi = gi_all[t * B_:(t + 1) * B_, :]               # (B, 3H)
                gh = jnp.dot(h, whh,
                             preferred_element_type=jnp.float32) + bhh
                r = jax.nn.sigmoid(gi[:, 0:H] + gh[:, 0:H])
                z = jax.nn.sigmoid(gi[:, H:2 * H] + gh[:, H:2 * H])
                n = jnp.tanh(gi[:, 2 * H:3 * H] + r * gh[:, 2 * H:3 * H])
                h = (1.0 - z) * n + z * h
                if write_seq:
                    seq_sc[t * B_:(t + 1) * B_, :] = h
            return h

        layer_in = x_ref[...]                                     # (T*B, E)
        h_last = None
        for l in range(nlayers):
            wih_ref, whh_ref, bih_ref, bhh_ref = layer_refs[4 * l:4 * l + 4]
            # Hoisted input->gate projection: one MXU push per layer.
            gi_all = jnp.dot(layer_in, wih_ref[...],
                             preferred_element_type=jnp.float32) + bih_ref[...]
            is_last = (l == nlayers - 1)
            # Last layer's sequence is dead (only h_T feeds en2de) -> don't store it.
            h_last = run_recurrence(gi_all, whh_ref, bhh_ref, write_seq=not is_last)
            if not is_last:
                layer_in = seq_sc[...]                            # VMEM-resident seq

        # Epilogue: h_t = tanh(en2de(h_t[-1])) -> the only tensor written to HBM.
        out_ref[...] = jnp.tanh(
            jnp.dot(h_last, wde_ref[...],
                    preferred_element_type=jnp.float32) + bde_ref[...])

    return kernel


# ------------------------- wrapper -------------------------

def _vmem_spec():
    return pl.BlockSpec(memory_space=pltpu.MemorySpace.VMEM)


def encoder_rnn_forward(params, inp, pos1, pos2):
    # Embedding lookups done directly in time-major order (no extra transpose op).
    embd = jnp.concatenate([
        params["word_emb"][inp.T],    # (T, B, EMB_DIM)
        params["pos1_emb"][pos1.T],   # (T, B, dimWPE)
        params["pos2_emb"][pos2.T],   # (T, B, dimWPE)
    ], axis=2)
    # TODO(synk): nn.Dropout (after embedding and between GRU layers) is stochastic
    # in train mode; treated as identity (eval mode).
    T_, B_, E = embd.shape
    x2d = embd.reshape(T_ * B_, E).astype(jnp.float32)            # time-major (T*B, E)

    args = [x2d]
    for l in range(NLAYERS):
        args += [params["w_ih_t"][l], params["w_hh_t"][l],
                 params["b_ih"][l], params["b_hh"][l]]
    args += [params["en2de_w_t"], params["en2de_b"]]

    return pl.pallas_call(
        _make_fused_encoder_kernel(NLAYERS, T_, B_, HIDDEN),
        out_shape=jax.ShapeDtypeStruct((B_, HIDDEN), jnp.float32),
        in_specs=[_vmem_spec()] * len(args),
        out_specs=_vmem_spec(),
        scratch_shapes=[pltpu.VMEM((T_ * B_, HIDDEN), jnp.float32)],
    )(*args)


# ------------------------- deterministic param init -------------------------

def _xavier_uniform(key, shape):
    fan_out, fan_in = shape
    a = (6.0 / (fan_in + fan_out)) ** 0.5
    return jax.random.uniform(key, shape, jnp.float32, -a, a)


def _orthogonal(key, shape):
    a = jax.random.normal(key, (max(shape), min(shape)), jnp.float32)
    q, _ = jnp.linalg.qr(a)
    q = q[:shape[0], :shape[1]] if shape[0] >= shape[1] else q.T[:shape[0], :shape[1]]
    return q.astype(jnp.float32)


def init_params(key):
    keys = jax.random.split(key, 4 + 2 * NLAYERS)
    params = {
        "word_emb": jax.random.normal(keys[0], (VOCAB, EMB_DIM), jnp.float32) * 0.1,
        "pos1_emb": jax.random.normal(keys[1], (MaxPos, dimWPE), jnp.float32) * 0.1,
        "pos2_emb": jax.random.normal(keys[2], (MaxPos, dimWPE), jnp.float32) * 0.1,
        # Pre-transposed / pre-reshaped once here (not per forward call).
        "en2de_w_t": jnp.transpose(_xavier_uniform(keys[3], (HIDDEN, HIDDEN))),  # (H, H)
        "en2de_b":   jnp.zeros((1, HIDDEN), jnp.float32),
        "w_ih_t": [], "w_hh_t": [], "b_ih": [], "b_hh": [],
    }
    for l in range(NLAYERS):
        in_dim = E_IN if l == 0 else HIDDEN
        params["w_ih_t"].append(
            jnp.transpose(_xavier_uniform(keys[4 + 2 * l], (3 * HIDDEN, in_dim))))  # (E_l, 3H)
        params["w_hh_t"].append(
            jnp.transpose(_orthogonal(keys[5 + 2 * l], (3 * HIDDEN, HIDDEN))))      # (H, 3H)
        params["b_ih"].append(jnp.zeros((1, 3 * HIDDEN), jnp.float32))  # init constant 0
        params["b_hh"].append(jnp.zeros((1, 3 * HIDDEN), jnp.float32))
    return params


if __name__ == "__main__":
    key = jax.random.PRNGKey(0)
    k_param, k_inp, k_p1, k_p2 = jax.random.split(key, 4)
    params = init_params(k_param)

    inp = jax.random.randint(k_inp, (B, T), 0, VOCAB, dtype=jnp.int32)
    pos1 = jax.random.randint(k_p1, (B, T), 0, MaxPos, dtype=jnp.int32)
    pos2 = jax.random.randint(k_p2, (B, T), 0, MaxPos, dtype=jnp.int32)

    out = jax.jit(encoder_rnn_forward)(params, inp, pos1, pos2)
    out = jax.block_until_ready(out)
    assert out.shape == (B, HIDDEN) and out.dtype == jnp.float32
    assert bool(jnp.all(jnp.isfinite(out)))
    print("KERNEL_OK")
</pallas_src>

<mosaic_0001>
module attributes {stable_mosaic.version = 11 : i64} {
  func.func @kernel(%arg0: memref<16x48xf32, #tpu.memory_space<vmem>>, %arg1: memref<48x96xf32, #tpu.memory_space<vmem>>, %arg2: memref<32x96xf32, #tpu.memory_space<vmem>>, %arg3: memref<1x96xf32, #tpu.memory_space<vmem>>, %arg4: memref<1x96xf32, #tpu.memory_space<vmem>>, %arg5: memref<32x96xf32, #tpu.memory_space<vmem>>, %arg6: memref<32x96xf32, #tpu.memory_space<vmem>>, %arg7: memref<1x96xf32, #tpu.memory_space<vmem>>, %arg8: memref<1x96xf32, #tpu.memory_space<vmem>>, %arg9: memref<32x32xf32, #tpu.memory_space<vmem>>, %arg10: memref<1x32xf32, #tpu.memory_space<vmem>>, %arg11: memref<2x32xf32, #tpu.memory_space<vmem>>, %arg12: memref<16x32xf32, #tpu.memory_space<vmem>>) attributes {dimension_semantics = [], scalar_prefetch = 0 : i64, scratch_operands = 1 : i64, tpu.core_type = #tpu.core_type<tc>} {
    %c0 = arith.constant 0 : index
    %c0_0 = arith.constant 0 : index
    %0 = vector.load %arg0[%c0, %c0_0] : memref<16x48xf32, #tpu.memory_space<vmem>>, vector<16x48xf32>
    %c0_1 = arith.constant 0 : index
    %c0_2 = arith.constant 0 : index
    %1 = vector.load %arg1[%c0_1, %c0_2] : memref<48x96xf32, #tpu.memory_space<vmem>>, vector<48x96xf32>
    %cst = arith.constant dense<0.000000e+00> : vector<16x96xf32>
    %2 = tpu.matmul %0, %1, %cst {dimension_numbers = #tpu.dot_dimension_numbers<[1], [0], [0], [1], [0, 0, 1, 1], [], []>} : vector<16x48xf32>, vector<48x96xf32>, vector<16x96xf32> -> vector<16x96xf32>
    %c0_3 = arith.constant 0 : index
    %c0_4 = arith.constant 0 : index
    %3 = vector.load %arg3[%c0_3, %c0_4] : memref<1x96xf32, #tpu.memory_space<vmem>>, vector<1x96xf32>
    %4 = vector.broadcast %3 : vector<1x96xf32> to vector<16x96xf32>
    %5 = arith.addf %2, %4 : vector<16x96xf32>
    %c0_5 = arith.constant 0 : index
    %c0_6 = arith.constant 0 : index
    %6 = vector.load %arg2[%c0_5, %c0_6] : memref<32x96xf32, #tpu.memory_space<vmem>>, vector<32x96xf32>
    %c0_7 = arith.constant 0 : index
    %c0_8 = arith.constant 0 : index
    %7 = vector.load %arg4[%c0_7, %c0_8] : memref<1x96xf32, #tpu.memory_space<vmem>>, vector<1x96xf32>
    %8 = vector.shape_cast %7 : vector<1x96xf32> to vector<1x96xf32>
    %9 = vector.broadcast %8 : vector<1x96xf32> to vector<2x96xf32>
    %cst_9 = arith.constant 0.000000e+00 : f32
    %10 = vector.broadcast %cst_9 : f32 to vector<2x32xf32>
    %11 = vector.extract_strided_slice %5 {offsets = [0, 0], sizes = [2, 96], strides = [1, 1]} : vector<16x96xf32> to vector<2x96xf32>
    %cst_10 = arith.constant dense<0.000000e+00> : vector<2x96xf32>
    %12 = tpu.matmul %10, %6, %cst_10 {dimension_numbers = #tpu.dot_dimension_numbers<[1], [0], [0], [1], [0, 0, 1, 1], [], []>} : vector<2x32xf32>, vector<32x96xf32>, vector<2x96xf32> -> vector<2x96xf32>
    %13 = arith.addf %12, %9 : vector<2x96xf32>
    %14 = vector.extract_strided_slice %11 {offsets = [0, 0], sizes = [2, 32], strides = [1, 1]} : vector<2x96xf32> to vector<2x32xf32>
    %15 = vector.extract_strided_slice %13 {offsets = [0, 0], sizes = [2, 32], strides = [1, 1]} : vector<2x96xf32> to vector<2x32xf32>
    %16 = arith.addf %14, %15 : vector<2x32xf32>
    %17 = arith.negf %16 : vector<2x32xf32>
    %18 = math.exp %17 : vector<2x32xf32>
    %cst_11 = arith.constant 1.000000e+00 : f32
    %19 = vector.broadcast %cst_11 : f32 to vector<2x32xf32>
    %20 = arith.addf %19, %18 : vector<2x32xf32>
    %21 = arith.divf %19, %20 : vector<2x32xf32>
    %22 = vector.extract_strided_slice %11 {offsets = [0, 32], sizes = [2, 32], strides = [1, 1]} : vector<2x96xf32> to vector<2x32xf32>
    %23 = vector.extract_strided_slice %13 {offsets = [0, 32], sizes = [2, 32], strides = [1, 1]} : vector<2x96xf32> to vector<2x32xf32>
    %24 = arith.addf %22, %23 : vector<2x32xf32>
    %25 = arith.negf %24 : vector<2x32xf32>
    %26 = math.exp %25 : vector<2x32xf32>
    %cst_12 = arith.constant 1.000000e+00 : f32
    %27 = vector.broadcast %cst_12 : f32 to vector<2x32xf32>
    %28 = arith.addf %27, %26 : vector<2x32xf32>
    %29 = arith.divf %27, %28 : vector<2x32xf32>
    %30 = vector.extract_strided_slice %11 {offsets = [0, 64], sizes = [2, 32], strides = [1, 1]} : vector<2x96xf32> to vector<2x32xf32>
    %31 = vector.extract_strided_slice %13 {offsets = [0, 64], sizes = [2, 32], strides = [1, 1]} : vector<2x96xf32> to vector<2x32xf32>
    %32 = arith.mulf %21, %31 : vector<2x32xf32>
    %33 = arith.addf %30, %32 : vector<2x32xf32>
    %34 = math.tanh %33 : vector<2x32xf32>
    %cst_13 = arith.constant 1.000000e+00 : f32
    %35 = vector.broadcast %cst_13 : f32 to vector<2x32xf32>
    %36 = arith.subf %35, %29 : vector<2x32xf32>
    %37 = arith.mulf %36, %34 : vector<2x32xf32>
    %38 = arith.mulf %29, %10 : vector<2x32xf32>
    %39 = arith.addf %37, %38 : vector<2x32xf32>
    %c0_14 = arith.constant 0 : index
    %c0_15 = arith.constant 0 : index
    %40 = vector.load %arg12[%c0_14, %c0_15] : memref<16x32xf32, #tpu.memory_space<vmem>>, vector<2x32xf32>
    tpu.vector_store %arg12[%c0_14, %c0_15], %39 {strides = array<i32>} : memref<16x32xf32, #tpu.memory_space<vmem>>, vector<2x32xf32>,
    %41 = vector.extract_strided_slice %5 {offsets = [2, 0], sizes = [2, 96], strides = [1, 1]} : vector<16x96xf32> to vector<2x96xf32>
    %cst_16 = arith.constant dense<0.000000e+00> : vector<2x96xf32>
    %42 = tpu.matmul %39, %6, %cst_16 {dimension_numbers = #tpu.dot_dimension_numbers<[1], [0], [0], [1], [0, 0, 1, 1], [], []>} : vector<2x32xf32>, vector<32x96xf32>, vector<2x96xf32> -> vector<2x96xf32>
    %43 = arith.addf %42, %9 : vector<2x96xf32>
    %44 = vector.extract_strided_slice %41 {offsets = [0, 0], sizes = [2, 32], strides = [1, 1]} : vector<2x96xf32> to vector<2x32xf32>
    %45 = vector.extract_strided_slice %43 {offsets = [0, 0], sizes = [2, 32], strides = [1, 1]} : vector<2x96xf32> to vector<2x32xf32>
    %46 = arith.addf %44, %45 : vector<2x32xf32>
    %47 = arith.negf %46 : vector<2x32xf32>
    %48 = math.exp %47 : vector<2x32xf32>
    %cst_17 = arith.constant 1.000000e+00 : f32
    %49 = vector.broadcast %cst_17 : f32 to vector<2x32xf32>
    %50 = arith.addf %49, %48 : vector<2x32xf32>
    %51 = arith.divf %49, %50 : vector<2x32xf32>
    %52 = vector.extract_strided_slice %41 {offsets = [0, 32], sizes = [2, 32], strides = [1, 1]} : vector<2x96xf32> to vector<2x32xf32>
    %53 = vector.extract_strided_slice %43 {offsets = [0, 32], sizes = [2, 32], strides = [1, 1]} : vector<2x96xf32> to vector<2x32xf32>
    %54 = arith.addf %52, %53 : vector<2x32xf32>
    %55 = arith.negf %54 : vector<2x32xf32>
    %56 = math.exp %55 : vector<2x32xf32>
    %cst_18 = arith.constant 1.000000e+00 : f32
    %57 = vector.broadcast %cst_18 : f32 to vector<2x32xf32>
    %58 = arith.addf %57, %56 : vector<2x32xf32>
    %59 = arith.divf %57, %58 : vector<2x32xf32>
    %60 = vector.extract_strided_slice %41 {offsets = [0, 64], sizes = [2, 32], strides = [1, 1]} : vector<2x96xf32> to vector<2x32xf32>
    %61 = vector.extract_strided_slice %43 {offsets = [0, 64], sizes = [2, 32], strides = [1, 1]} : vector<2x96xf32> to vector<2x32xf32>
    %62 = arith.mulf %51, %61 : vector<2x32xf32>
    %63 = arith.addf %60, %62 : vector<2x32xf32>
    %64 = math.tanh %63 : vector<2x32xf32>
    %cst_19 = arith.constant 1.000000e+00 : f32
    %65 = vector.broadcast %cst_19 : f32 to vector<2x32xf32>
    %66 = arith.subf %65, %59 : vector<2x32xf32>
    %67 = arith.mulf %66, %64 : vector<2x32xf32>
    %68 = arith.mulf %59, %39 : vector<2x32xf32>
    %69 = arith.addf %67, %68 : vector<2x32xf32>
    %c2 = arith.constant 2 : index
    %c0_20 = arith.constant 0 : index
    %70 = vector.load %arg12[%c2, %c0_20] : memref<16x32xf32, #tpu.memory_space<vmem>>, vector<2x32xf32>
    tpu.vector_store %arg12[%c2, %c0_20], %69 {strides = array<i32>} : memref<16x32xf32, #tpu.memory_space<vmem>>, vector<2x32xf32>,
    %71 = vector.extract_strided_slice %5 {offsets = [4, 0], sizes = [2, 96], strides = [1, 1]} : vector<16x96xf32> to vector<2x96xf32>
    %cst_21 = arith.constant dense<0.000000e+00> : vector<2x96xf32>
    %72 = tpu.matmul %69, %6, %cst_21 {dimension_numbers = #tpu.dot_dimension_numbers<[1], [0], [0], [1], [0, 0, 1, 1], [], []>} : vector<2x32xf32>, vector<32x96xf32>, vector<2x96xf32> -> vector<2x96xf32>
    %73 = arith.addf %72, %9 : vector<2x96xf32>
    %74 = vector.extract_strided_slice %71 {offsets = [0, 0], sizes = [2, 32], strides = [1, 1]} : vector<2x96xf32> to vector<2x32xf32>
    %75 = vector.extract_strided_slice %73 {offsets = [0, 0], sizes = [2, 32], strides = [1, 1]} : vector<2x96xf32> to vector<2x32xf32>
    %76 = arith.addf %74, %75 : vector<2x32xf32>
    %77 = arith.negf %76 : vector<2x32xf32>
    %78 = math.exp %77 : vector<2x32xf32>
    %cst_22 = arith.constant 1.000000e+00 : f32
    %79 = vector.broadcast %cst_22 : f32 to vector<2x32xf32>
    %80 = arith.addf %79, %78 : vector<2x32xf32>
    %81 = arith.divf %79, %80 : vector<2x32xf32>
    %82 = vector.extract_strided_slice %71 {offsets = [0, 32], sizes = [2, 32], strides = [1, 1]} : vector<2x96xf32> to vector<2x32xf32>
    %83 = vector.extract_strided_slice %73 {offsets = [0, 32], sizes = [2, 32], strides = [1, 1]} : vector<2x96xf32> to vector<2x32xf32>
    %84 = arith.addf %82, %83 : vector<2x32xf32>
    %85 = arith.negf %84 : vector<2x32xf32>
    %86 = math.exp %85 : vector<2x32xf32>
    %cst_23 = arith.constant 1.000000e+00 : f32
    %87 = vector.broadcast %cst_23 : f32 to vector<2x32xf32>
    %88 = arith.addf %87, %86 : vector<2x32xf32>
    %89 = arith.divf %87, %88 : vector<2x32xf32>
    %90 = vector.extract_strided_slice %71 {offsets = [0, 64], sizes = [2, 32], strides = [1, 1]} : vector<2x96xf32> to vector<2x32xf32>
    %91 = vector.extract_strided_slice %73 {offsets = [0, 64], sizes = [2, 32], strides = [1, 1]} : vector<2x96xf32> to vector<2x32xf32>
    %92 = arith.mulf %81, %91 : vector<2x32xf32>
    %93 = arith.addf %90, %92 : vector<2x32xf32>
    %94 = math.tanh %93 : vector<2x32xf32>
    %cst_24 = arith.constant 1.000000e+00 : f32
    %95 = vector.broadcast %cst_24 : f32 to vector<2x32xf32>
    %96 = arith.subf %95, %89 : vector<2x32xf32>
    %97 = arith.mulf %96, %94 : vector<2x32xf32>
    %98 = arith.mulf %89, %69 : vector<2x32xf32>
    %99 = arith.addf %97, %98 : vector<2x32xf32>
    %c4 = arith.constant 4 : index
    %c0_25 = arith.constant 0 : index
    %100 = vector.load %arg12[%c4, %c0_25] : memref<16x32xf32, #tpu.memory_space<vmem>>, vector<2x32xf32>
    tpu.vector_store %arg12[%c4, %c0_25], %99 {strides = array<i32>} : memref<16x32xf32, #tpu.memory_space<vmem>>, vector<2x32xf32>,
    %101 = vector.extract_strided_slice %5 {offsets = [6, 0], sizes = [2, 96], strides = [1, 1]} : vector<16x96xf32> to vector<2x96xf32>
    %cst_26 = arith.constant dense<0.000000e+00> : vector<2x96xf32>
    %102 = tpu.matmul %99, %6, %cst_26 {dimension_numbers = #tpu.dot_dimension_numbers<[1], [0], [0], [1], [0, 0, 1, 1], [], []>} : vector<2x32xf32>, vector<32x96xf32>, vector<2x96xf32> -> vector<2x96xf32>
    %103 = arith.addf %102, %9 : vector<2x96xf32>
    %104 = vector.extract_strided_slice %101 {offsets = [0, 0], sizes = [2, 32], strides = [1, 1]} : vector<2x96xf32> to vector<2x32xf32>
    %105 = vector.extract_strided_slice %103 {offsets = [0, 0], sizes = [2, 32], strides = [1, 1]} : vector<2x96xf32> to vector<2x32xf32>
    %106 = arith.addf %104, %105 : vector<2x32xf32>
    %107 = arith.negf %106 : vector<2x32xf32>
    %108 = math.exp %107 : vector<2x32xf32>
    %cst_27 = arith.constant 1.000000e+00 : f32
    %109 = vector.broadcast %cst_27 : f32 to vector<2x32xf32>
    %110 = arith.addf %109, %108 : vector<2x32xf32>
    %111 = arith.divf %109, %110 : vector<2x32xf32>
    %112 = vector.extract_strided_slice %101 {offsets = [0, 32], sizes = [2, 32], strides = [1, 1]} : vector<2x96xf32> to vector<2x32xf32>
    %113 = vector.extract_strided_slice %103 {offsets = [0, 32], sizes = [2, 32], strides = [1, 1]} : vector<2x96xf32> to vector<2x32xf32>
    %114 = arith.addf %112, %113 : vector<2x32xf32>
    %115 = arith.negf %114 : vector<2x32xf32>
    %116 = math.exp %115 : vector<2x32xf32>
    %cst_28 = arith.constant 1.000000e+00 : f32
    %117 = vector.broadcast %cst_28 : f32 to vector<2x32xf32>
    %118 = arith.addf %117, %116 : vector<2x32xf32>
    %119 = arith.divf %117, %118 : vector<2x32xf32>
    %120 = vector.extract_strided_slice %101 {offsets = [0, 64], sizes = [2, 32], strides = [1, 1]} : vector<2x96xf32> to vector<2x32xf32>
    %121 = vector.extract_strided_slice %103 {offsets = [0, 64], sizes = [2, 32], strides = [1, 1]} : vector<2x96xf32> to vector<2x32xf32>
    %122 = arith.mulf %111, %121 : vector<2x32xf32>
    %123 = arith.addf %120, %122 : vector<2x32xf32>
    %124 = math.tanh %123 : vector<2x32xf32>
    %cst_29 = arith.constant 1.000000e+00 : f32
    %125 = vector.broadcast %cst_29 : f32 to vector<2x32xf32>
    %126 = arith.subf %125, %119 : vector<2x32xf32>
    %127 = arith.mulf %126, %124 : vector<2x32xf32>
    %128 = arith.mulf %119, %99 : vector<2x32xf32>
    %129 = arith.addf %127, %128 : vector<2x32xf32>
    %c6 = arith.constant 6 : index
    %c0_30 = arith.constant 0 : index
    %130 = vector.load %arg12[%c6, %c0_30] : memref<16x32xf32, #tpu.memory_space<vmem>>, vector<2x32xf32>
    tpu.vector_store %arg12[%c6, %c0_30], %129 {strides = array<i32>} : memref<16x32xf32, #tpu.memory_space<vmem>>, vector<2x32xf32>,
    %131 = vector.extract_strided_slice %5 {offsets = [8, 0], sizes = [2, 96], strides = [1, 1]} : vector<16x96xf32> to vector<2x96xf32>
    %cst_31 = arith.constant dense<0.000000e+00> : vector<2x96xf32>
    %132 = tpu.matmul %129, %6, %cst_31 {dimension_numbers = #tpu.dot_dimension_numbers<[1], [0], [0], [1], [0, 0, 1, 1], [], []>} : vector<2x32xf32>, vector<32x96xf32>, vector<2x96xf32> -> vector<2x96xf32>
    %133 = arith.addf %132, %9 : vector<2x96xf32>
    %134 = vector.extract_strided_slice %131 {offsets = [0, 0], sizes = [2, 32], strides = [1, 1]} : vector<2x96xf32> to vector<2x32xf32>
    %135 = vector.extract_strided_slice %133 {offsets = [0, 0], sizes = [2, 32], strides = [1, 1]} : vector<2x96xf32> to vector<2x32xf32>
    %136 = arith.addf %134, %135 : vector<2x32xf32>
    %137 = arith.negf %136 : vector<2x32xf32>
    %138 = math.exp %137 : vector<2x32xf32>
    %cst_32 = arith.constant 1.000000e+00 : f32
    %139 = vector.broadcast %cst_32 : f32 to vector<2x32xf32>
    %140 = arith.addf %139, %138 : vector<2x32xf32>
    %141 = arith.divf %139, %140 : vector<2x32xf32>
    %142 = vector.extract_strided_slice %131 {offsets = [0, 32], sizes = [2, 32], strides = [1, 1]} : vector<2x96xf32> to vector<2x32xf32>
    %143 = vector.extract_strided_slice %133 {offsets = [0, 32], sizes = [2, 32], strides = [1, 1]} : vector<2x96xf32> to vector<2x32xf32>
    %144 = arith.addf %142, %143 : vector<2x32xf32>
    %145 = arith.negf %144 : vector<2x32xf32>
    %146 = math.exp %145 : vector<2x32xf32>
    %cst_33 = arith.constant 1.000000e+00 : f32
    %147 = vector.broadcast %cst_33 : f32 to vector<2x32xf32>
    %148 = arith.addf %147, %146 : vector<2x32xf32>
    %149 = arith.divf %147, %148 : vector<2x32xf32>
    %150 = vector.extract_strided_slice %131 {offsets = [0, 64], sizes = [2, 32], strides = [1, 1]} : vector<2x96xf32> to vector<2x32xf32>
    %151 = vector.extract_strided_slice %133 {offsets = [0, 64], sizes = [2, 32], strides = [1, 1]} : vector<2x96xf32> to vector<2x32xf32>
    %152 = arith.mulf %141, %151 : vector<2x32xf32>
    %153 = arith.addf %150, %152 : vector<2x32xf32>
    %154 = math.tanh %153 : vector<2x32xf32>
    %cst_34 = arith.constant 1.000000e+00 : f32
    %155 = vector.broadcast %cst_34 : f32 to vector<2x32xf32>
    %156 = arith.subf %155, %149 : vector<2x32xf32>
    %157 = arith.mulf %156, %154 : vector<2x32xf32>
    %158 = arith.mulf %149, %129 : vector<2x32xf32>
    %159 = arith.addf %157, %158 : vector<2x32xf32>
    %c8 = arith.constant 8 : index
    %c0_35 = arith.constant 0 : index
    %160 = vector.load %arg12[%c8, %c0_35] : memref<16x32xf32, #tpu.memory_space<vmem>>, vector<2x32xf32>
    tpu.vector_store %arg12[%c8, %c0_35], %159 {strides = array<i32>} : memref<16x32xf32, #tpu.memory_space<vmem>>, vector<2x32xf32>,
    %161 = vector.extract_strided_slice %5 {offsets = [10, 0], sizes = [2, 96], strides = [1, 1]} : vector<16x96xf32> to vector<2x96xf32>
    %cst_36 = arith.constant dense<0.000000e+00> : vector<2x96xf32>
    %162 = tpu.matmul %159, %6, %cst_36 {dimension_numbers = #tpu.dot_dimension_numbers<[1], [0], [0], [1], [0, 0, 1, 1], [], []>} : vector<2x32xf32>, vector<32x96xf32>, vector<2x96xf32> -> vector<2x96xf32>
    %163 = arith.addf %162, %9 : vector<2x96xf32>
    %164 = vector.extract_strided_slice %161 {offsets = [0, 0], sizes = [2, 32], strides = [1, 1]} : vector<2x96xf32> to vector<2x32xf32>
    %165 = vector.extract_strided_slice %163 {offsets = [0, 0], sizes = [2, 32], strides = [1, 1]} : vector<2x96xf32> to vector<2x32xf32>
    %166 = arith.addf %164, %165 : vector<2x32xf32>
    %167 = arith.negf %166 : vector<2x32xf32>
    %168 = math.exp %167 : vector<2x32xf32>
    %cst_37 = arith.constant 1.000000e+00 : f32
    %169 = vector.broadcast %cst_37 : f32 to vector<2x32xf32>
    %170 = arith.addf %169, %168 : vector<2x32xf32>
    %171 = arith.divf %169, %170 : vector<2x32xf32>
    %172 = vector.extract_strided_slice %161 {offsets = [0, 32], sizes = [2, 32], strides = [1, 1]} : vector<2x96xf32> to vector<2x32xf32>
    %173 = vector.extract_strided_slice %163 {offsets = [0, 32], sizes = [2, 32], strides = [1, 1]} : vector<2x96xf32> to vector<2x32xf32>
    %174 = arith.addf %172, %173 : vector<2x32xf32>
    %175 = arith.negf %174 : vector<2x32xf32>
    %176 = math.exp %175 : vector<2x32xf32>
    %cst_38 = arith.constant 1.000000e+00 : f32
    %177 = vector.broadcast %cst_38 : f32 to vector<2x32xf32>
    %178 = arith.addf %177, %176 : vector<2x32xf32>
    %179 = arith.divf %177, %178 : vector<2x32xf32>
    %180 = vector.extract_strided_slice %161 {offsets = [0, 64], sizes = [2, 32], strides = [1, 1]} : vector<2x96xf32> to vector<2x32xf32>
    %181 = vector.extract_strided_slice %163 {offsets = [0, 64], sizes = [2, 32], strides = [1, 1]} : vector<2x96xf32> to vector<2x32xf32>
    %182 = arith.mulf %171, %181 : vector<2x32xf32>
    %183 = arith.addf %180, %182 : vector<2x32xf32>
    %184 = math.tanh %183 : vector<2x32xf32>
    %cst_39 = arith.constant 1.000000e+00 : f32
    %185 = vector.broadcast %cst_39 : f32 to vector<2x32xf32>
    %186 = arith.subf %185, %179 : vector<2x32xf32>
    %187 = arith.mulf %186, %184 : vector<2x32xf32>
    %188 = arith.mulf %179, %159 : vector<2x32xf32>
    %189 = arith.addf %187, %188 : vector<2x32xf32>
    %c10 = arith.constant 10 : index
    %c0_40 = arith.constant 0 : index
    %190 = vector.load %arg12[%c10, %c0_40] : memref<16x32xf32, #tpu.memory_space<vmem>>, vector<2x32xf32>
    tpu.vector_store %arg12[%c10, %c0_40], %189 {strides = array<i32>} : memref<16x32xf32, #tpu.memory_space<vmem>>, vector<2x32xf32>,
    %191 = vector.extract_strided_slice %5 {offsets = [12, 0], sizes = [2, 96], strides = [1, 1]} : vector<16x96xf32> to vector<2x96xf32>
    %cst_41 = arith.constant dense<0.000000e+00> : vector<2x96xf32>
    %192 = tpu.matmul %189, %6, %cst_41 {dimension_numbers = #tpu.dot_dimension_numbers<[1], [0], [0], [1], [0, 0, 1, 1], [], []>} : vector<2x32xf32>, vector<32x96xf32>, vector<2x96xf32> -> vector<2x96xf32>
    %193 = arith.addf %192, %9 : vector<2x96xf32>
    %194 = vector.extract_strided_slice %191 {offsets = [0, 0], sizes = [2, 32], strides = [1, 1]} : vector<2x96xf32> to vector<2x32xf32>
    %195 = vector.extract_strided_slice %193 {offsets = [0, 0], sizes = [2, 32], strides = [1, 1]} : vector<2x96xf32> to vector<2x32xf32>
    %196 = arith.addf %194, %195 : vector<2x32xf32>
    %197 = arith.negf %196 : vector<2x32xf32>
    %198 = math.exp %197 : vector<2x32xf32>
    %cst_42 = arith.constant 1.000000e+00 : f32
    %199 = vector.broadcast %cst_42 : f32 to vector<2x32xf32>
    %200 = arith.addf %199, %198 : vector<2x32xf32>
    %201 = arith.divf %199, %200 : vector<2x32xf32>
    %202 = vector.extract_strided_slice %191 {offsets = [0, 32], sizes = [2, 32], strides = [1, 1]} : vector<2x96xf32> to vector<2x32xf32>
    %203 = vector.extract_strided_slice %193 {offsets = [0, 32], sizes = [2, 32], strides = [1, 1]} : vector<2x96xf32> to vector<2x32xf32>
    %204 = arith.addf %202, %203 : vector<2x32xf32>
    %205 = arith.negf %204 : vector<2x32xf32>
    %206 = math.exp %205 : vector<2x32xf32>
    %cst_43 = arith.constant 1.000000e+00 : f32
    %207 = vector.broadcast %cst_43 : f32 to vector<2x32xf32>
    %208 = arith.addf %207, %206 : vector<2x32xf32>
    %209 = arith.divf %207, %208 : vector<2x32xf32>
    %210 = vector.extract_strided_slice %191 {offsets = [0, 64], sizes = [2, 32], strides = [1, 1]} : vector<2x96xf32> to vector<2x32xf32>
    %211 = vector.extract_strided_slice %193 {offsets = [0, 64], sizes = [2, 32], strides = [1, 1]} : vector<2x96xf32> to vector<2x32xf32>
    %212 = arith.mulf %201, %211 : vector<2x32xf32>
    %213 = arith.addf %210, %212 : vector<2x32xf32>
    %214 = math.tanh %213 : vector<2x32xf32>
    %cst_44 = arith.constant 1.000000e+00 : f32
    %215 = vector.broadcast %cst_44 : f32 to vector<2x32xf32>
    %216 = arith.subf %215, %209 : vector<2x32xf32>
    %217 = arith.mulf %216, %214 : vector<2x32xf32>
    %218 = arith.mulf %209, %189 : vector<2x32xf32>
    %219 = arith.addf %217, %218 : vector<2x32xf32>
    %c12 = arith.constant 12 : index
    %c0_45 = arith.constant 0 : index
    %220 = vector.load %arg12[%c12, %c0_45] : memref<16x32xf32, #tpu.memory_space<vmem>>, vector<2x32xf32>
    tpu.vector_store %arg12[%c12, %c0_45], %219 {strides = array<i32>} : memref<16x32xf32, #tpu.memory_space<vmem>>, vector<2x32xf32>,
    %221 = vector.extract_strided_slice %5 {offsets = [14, 0], sizes = [2, 96], strides = [1, 1]} : vector<16x96xf32> to vector<2x96xf32>
    %cst_46 = arith.constant dense<0.000000e+00> : vector<2x96xf32>
    %222 = tpu.matmul %219, %6, %cst_46 {dimension_numbers = #tpu.dot_dimension_numbers<[1], [0], [0], [1], [0, 0, 1, 1], [], []>} : vector<2x32xf32>, vector<32x96xf32>, vector<2x96xf32> -> vector<2x96xf32>
    %223 = arith.addf %222, %9 : vector<2x96xf32>
    %224 = vector.extract_strided_slice %221 {offsets = [0, 0], sizes = [2, 32], strides = [1, 1]} : vector<2x96xf32> to vector<2x32xf32>
    %225 = vector.extract_strided_slice %223 {offsets = [0, 0], sizes = [2, 32], strides = [1, 1]} : vector<2x96xf32> to vector<2x32xf32>
    %226 = arith.addf %224, %225 : vector<2x32xf32>
    %227 = arith.negf %226 : vector<2x32xf32>
    %228 = math.exp %227 : vector<2x32xf32>
    %cst_47 = arith.constant 1.000000e+00 : f32
    %229 = vector.broadcast %cst_47 : f32 to vector<2x32xf32>
    %230 = arith.addf %229, %228 : vector<2x32xf32>
    %231 = arith.divf %229, %230 : vector<2x32xf32>
    %232 = vector.extract_strided_slice %221 {offsets = [0, 32], sizes = [2, 32], strides = [1, 1]} : vector<2x96xf32> to vector<2x32xf32>
    %233 = vector.extract_strided_slice %223 {offsets = [0, 32], sizes = [2, 32], strides = [1, 1]} : vector<2x96xf32> to vector<2x32xf32>
    %234 = arith.addf %232, %233 : vector<2x32xf32>
    %235 = arith.negf %234 : vector<2x32xf32>
    %236 = math.exp %235 : vector<2x32xf32>
    %cst_48 = arith.constant 1.000000e+00 : f32
    %237 = vector.broadcast %cst_48 : f32 to vector<2x32xf32>
    %238 = arith.addf %237, %236 : vector<2x32xf32>
    %239 = arith.divf %237, %238 : vector<2x32xf32>
    %240 = vector.extract_strided_slice %221 {offsets = [0, 64], sizes = [2, 32], strides = [1, 1]} : vector<2x96xf32> to vector<2x32xf32>
    %241 = vector.extract_strided_slice %223 {offsets = [0, 64], sizes = [2, 32], strides = [1, 1]} : vector<2x96xf32> to vector<2x32xf32>
    %242 = arith.mulf %231, %241 : vector<2x32xf32>
    %243 = arith.addf %240, %242 : vector<2x32xf32>
    %244 = math.tanh %243 : vector<2x32xf32>
    %cst_49 = arith.constant 1.000000e+00 : f32
    %245 = vector.broadcast %cst_49 : f32 to vector<2x32xf32>
    %246 = arith.subf %245, %239 : vector<2x32xf32>
    %247 = arith.mulf %246, %244 : vector<2x32xf32>
    %248 = arith.mulf %239, %219 : vector<2x32xf32>
    %249 = arith.addf %247, %248 : vector<2x32xf32>
    %c14 = arith.constant 14 : index
    %c0_50 = arith.constant 0 : index
    %250 = vector.load %arg12[%c14, %c0_50] : memref<16x32xf32, #tpu.memory_space<vmem>>, vector<2x32xf32>
    tpu.vector_store %arg12[%c14, %c0_50], %249 {strides = array<i32>} : memref<16x32xf32, #tpu.memory_space<vmem>>, vector<2x32xf32>,
    %c0_51 = arith.constant 0 : index
    %c0_52 = arith.constant 0 : index
    %251 = vector.load %arg12[%c0_51, %c0_52] : memref<16x32xf32, #tpu.memory_space<vmem>>, vector<16x32xf32>
    %c0_53 = arith.constant 0 : index
    %c0_54 = arith.constant 0 : index
    %252 = vector.load %arg5[%c0_53, %c0_54] : memref<32x96xf32, #tpu.memory_space<vmem>>, vector<32x96xf32>
    %cst_55 = arith.constant dense<0.000000e+00> : vector<16x96xf32>
    %253 = tpu.matmul %251, %252, %cst_55 {dimension_numbers = #tpu.dot_dimension_numbers<[1], [0], [0], [1], [0, 0, 1, 1], [], []>} : vector<16x32xf32>, vector<32x96xf32>, vector<16x96xf32> -> vector<16x96xf32>
    %c0_56 = arith.constant 0 : index
    %c0_57 = arith.constant 0 : index
    %254 = vector.load %arg7[%c0_56, %c0_57] : memref<1x96xf32, #tpu.memory_space<vmem>>, vector<1x96xf32>
    %255 = vector.broadcast %254 : vector<1x96xf32> to vector<16x96xf32>
    %256 = arith.addf %253, %255 : vector<16x96xf32>
    %c0_58 = arith.constant 0 : index
    %c0_59 = arith.constant 0 : index
    %257 = vector.load %arg6[%c0_58, %c0_59] : memref<32x96xf32, #tpu.memory_space<vmem>>, vector<32x96xf32>
    %c0_60 = arith.constant 0 : index
    %c0_61 = arith.constant 0 : index
    %258 = vector.load %arg8[%c0_60, %c0_61] : memref<1x96xf32, #tpu.memory_space<vmem>>, vector<1x96xf32>
    %259 = vector.shape_cast %258 : vector<1x96xf32> to vector<1x96xf32>
    %260 = vector.broadcast %259 : vector<1x96xf32> to vector<2x96xf32>
    %cst_62 = arith.constant 0.000000e+00 : f32
    %261 = vector.broadcast %cst_62 : f32 to vector<2x32xf32>
    %262 = vector.extract_strided_slice %256 {offsets = [0, 0], sizes = [2, 96], strides = [1, 1]} : vector<16x96xf32> to vector<2x96xf32>
    %cst_63 = arith.constant dense<0.000000e+00> : vector<2x96xf32>
    %263 = tpu.matmul %261, %257, %cst_63 {dimension_numbers = #tpu.dot_dimension_numbers<[1], [0], [0], [1], [0, 0, 1, 1], [], []>} : vector<2x32xf32>, vector<32x96xf32>, vector<2x96xf32> -> vector<2x96xf32>
    %264 = arith.addf %263, %260 : vector<2x96xf32>
    %265 = vector.extract_strided_slice %262 {offsets = [0, 0], sizes = [2, 32], strides = [1, 1]} : vector<2x96xf32> to vector<2x32xf32>
    %266 = vector.extract_strided_slice %264 {offsets = [0, 0], sizes = [2, 32], strides = [1, 1]} : vector<2x96xf32> to vector<2x32xf32>
    %267 = arith.addf %265, %266 : vector<2x32xf32>
    %268 = arith.negf %267 : vector<2x32xf32>
    %269 = math.exp %268 : vector<2x32xf32>
    %cst_64 = arith.constant 1.000000e+00 : f32
    %270 = vector.broadcast %cst_64 : f32 to vector<2x32xf32>
    %271 = arith.addf %270, %269 : vector<2x32xf32>
    %272 = arith.divf %270, %271 : vector<2x32xf32>
    %273 = vector.extract_strided_slice %262 {offsets = [0, 32], sizes = [2, 32], strides = [1, 1]} : vector<2x96xf32> to vector<2x32xf32>
    %274 = vector.extract_strided_slice %264 {offsets = [0, 32], sizes = [2, 32], strides = [1, 1]} : vector<2x96xf32> to vector<2x32xf32>
    %275 = arith.addf %273, %274 : vector<2x32xf32>
    %276 = arith.negf %275 : vector<2x32xf32>
    %277 = math.exp %276 : vector<2x32xf32>
    %cst_65 = arith.constant 1.000000e+00 : f32
    %278 = vector.broadcast %cst_65 : f32 to vector<2x32xf32>
    %279 = arith.addf %278, %277 : vector<2x32xf32>
    %280 = arith.divf %278, %279 : vector<2x32xf32>
    %281 = vector.extract_strided_slice %262 {offsets = [0, 64], sizes = [2, 32], strides = [1, 1]} : vector<2x96xf32> to vector<2x32xf32>
    %282 = vector.extract_strided_slice %264 {offsets = [0, 64], sizes = [2, 32], strides = [1, 1]} : vector<2x96xf32> to vector<2x32xf32>
    %283 = arith.mulf %272, %282 : vector<2x32xf32>
    %284 = arith.addf %281, %283 : vector<2x32xf32>
    %285 = math.tanh %284 : vector<2x32xf32>
    %cst_66 = arith.constant 1.000000e+00 : f32
    %286 = vector.broadcast %cst_66 : f32 to vector<2x32xf32>
    %287 = arith.subf %286, %280 : vector<2x32xf32>
    %288 = arith.mulf %287, %285 : vector<2x32xf32>
    %289 = arith.mulf %280, %261 : vector<2x32xf32>
    %290 = arith.addf %288, %289 : vector<2x32xf32>
    %291 = vector.extract_strided_slice %256 {offsets = [2, 0], sizes = [2, 96], strides = [1, 1]} : vector<16x96xf32> to vector<2x96xf32>
    %cst_67 = arith.constant dense<0.000000e+00> : vector<2x96xf32>
    %292 = tpu.matmul %290, %257, %cst_67 {dimension_numbers = #tpu.dot_dimension_numbers<[1], [0], [0], [1], [0, 0, 1, 1], [], []>} : vector<2x32xf32>, vector<32x96xf32>, vector<2x96xf32> -> vector<2x96xf32>
    %293 = arith.addf %292, %260 : vector<2x96xf32>
    %294 = vector.extract_strided_slice %291 {offsets = [0, 0], sizes = [2, 32], strides = [1, 1]} : vector<2x96xf32> to vector<2x32xf32>
    %295 = vector.extract_strided_slice %293 {offsets = [0, 0], sizes = [2, 32], strides = [1, 1]} : vector<2x96xf32> to vector<2x32xf32>
    %296 = arith.addf %294, %295 : vector<2x32xf32>
    %297 = arith.negf %296 : vector<2x32xf32>
    %298 = math.exp %297 : vector<2x32xf32>
    %cst_68 = arith.constant 1.000000e+00 : f32
    %299 = vector.broadcast %cst_68 : f32 to vector<2x32xf32>
    %300 = arith.addf %299, %298 : vector<2x32xf32>
    %301 = arith.divf %299, %300 : vector<2x32xf32>
    %302 = vector.extract_strided_slice %291 {offsets = [0, 32], sizes = [2, 32], strides = [1, 1]} : vector<2x96xf32> to vector<2x32xf32>
    %303 = vector.extract_strided_slice %293 {offsets = [0, 32], sizes = [2, 32], strides = [1, 1]} : vector<2x96xf32> to vector<2x32xf32>
    %304 = arith.addf %302, %303 : vector<2x32xf32>
    %305 = arith.negf %304 : vector<2x32xf32>
    %306 = math.exp %305 : vector<2x32xf32>
    %cst_69 = arith.constant 1.000000e+00 : f32
    %307 = vector.broadcast %cst_69 : f32 to vector<2x32xf32>
    %308 = arith.addf %307, %306 : vector<2x32xf32>
    %309 = arith.divf %307, %308 : vector<2x32xf32>
    %310 = vector.extract_strided_slice %291 {offsets = [0, 64], sizes = [2, 32], strides = [1, 1]} : vector<2x96xf32> to vector<2x32xf32>
    %311 = vector.extract_strided_slice %293 {offsets = [0, 64], sizes = [2, 32], strides = [1, 1]} : vector<2x96xf32> to vector<2x32xf32>
    %312 = arith.mulf %301, %311 : vector<2x32xf32>
    %313 = arith.addf %310, %312 : vector<2x32xf32>
    %314 = math.tanh %313 : vector<2x32xf32>
    %cst_70 = arith.constant 1.000000e+00 : f32
    %315 = vector.broadcast %cst_70 : f32 to vector<2x32xf32>
    %316 = arith.subf %315, %309 : vector<2x32xf32>
    %317 = arith.mulf %316, %314 : vector<2x32xf32>
    %318 = arith.mulf %309, %290 : vector<2x32xf32>
    %319 = arith.addf %317, %318 : vector<2x32xf32>
    %320 = vector.extract_strided_slice %256 {offsets = [4, 0], sizes = [2, 96], strides = [1, 1]} : vector<16x96xf32> to vector<2x96xf32>
    %cst_71 = arith.constant dense<0.000000e+00> : vector<2x96xf32>
    %321 = tpu.matmul %319, %257, %cst_71 {dimension_numbers = #tpu.dot_dimension_numbers<[1], [0], [0], [1], [0, 0, 1, 1], [], []>} : vector<2x32xf32>, vector<32x96xf32>, vector<2x96xf32> -> vector<2x96xf32>
    %322 = arith.addf %321, %260 : vector<2x96xf32>
    %323 = vector.extract_strided_slice %320 {offsets = [0, 0], sizes = [2, 32], strides = [1, 1]} : vector<2x96xf32> to vector<2x32xf32>
    %324 = vector.extract_strided_slice %322 {offsets = [0, 0], sizes = [2, 32], strides = [1, 1]} : vector<2x96xf32> to vector<2x32xf32>
    %325 = arith.addf %323, %324 : vector<2x32xf32>
    %326 = arith.negf %325 : vector<2x32xf32>
    %327 = math.exp %326 : vector<2x32xf32>
    %cst_72 = arith.constant 1.000000e+00 : f32
    %328 = vector.broadcast %cst_72 : f32 to vector<2x32xf32>
    %329 = arith.addf %328, %327 : vector<2x32xf32>
    %330 = arith.divf %328, %329 : vector<2x32xf32>
    %331 = vector.extract_strided_slice %320 {offsets = [0, 32], sizes = [2, 32], strides = [1, 1]} : vector<2x96xf32> to vector<2x32xf32>
    %332 = vector.extract_strided_slice %322 {offsets = [0, 32], sizes = [2, 32], strides = [1, 1]} : vector<2x96xf32> to vector<2x32xf32>
    %333 = arith.addf %331, %332 : vector<2x32xf32>
    %334 = arith.negf %333 : vector<2x32xf32>
    %335 = math.exp %334 : vector<2x32xf32>
    %cst_73 = arith.constant 1.000000e+00 : f32
    %336 = vector.broadcast %cst_73 : f32 to vector<2x32xf32>
    %337 = arith.addf %336, %335 : vector<2x32xf32>
    %338 = arith.divf %336, %337 : vector<2x32xf32>
    %339 = vector.extract_strided_slice %320 {offsets = [0, 64], sizes = [2, 32], strides = [1, 1]} : vector<2x96xf32> to vector<2x32xf32>
    %340 = vector.extract_strided_slice %322 {offsets = [0, 64], sizes = [2, 32], strides = [1, 1]} : vector<2x96xf32> to vector<2x32xf32>
    %341 = arith.mulf %330, %340 : vector<2x32xf32>
    %342 = arith.addf %339, %341 : vector<2x32xf32>
    %343 = math.tanh %342 : vector<2x32xf32>
    %cst_74 = arith.constant 1.000000e+00 : f32
    %344 = vector.broadcast %cst_74 : f32 to vector<2x32xf32>
    %345 = arith.subf %344, %338 : vector<2x32xf32>
    %346 = arith.mulf %345, %343 : vector<2x32xf32>
    %347 = arith.mulf %338, %319 : vector<2x32xf32>
    %348 = arith.addf %346, %347 : vector<2x32xf32>
    %349 = vector.extract_strided_slice %256 {offsets = [6, 0], sizes = [2, 96], strides = [1, 1]} : vector<16x96xf32> to vector<2x96xf32>
    %cst_75 = arith.constant dense<0.000000e+00> : vector<2x96xf32>
    %350 = tpu.matmul %348, %257, %cst_75 {dimension_numbers = #tpu.dot_dimension_numbers<[1], [0], [0], [1], [0, 0, 1, 1], [], []>} : vector<2x32xf32>, vector<32x96xf32>, vector<2x96xf32> -> vector<2x96xf32>
    %351 = arith.addf %350, %260 : vector<2x96xf32>
    %352 = vector.extract_strided_slice %349 {offsets = [0, 0], sizes = [2, 32], strides = [1, 1]} : vector<2x96xf32> to vector<2x32xf32>
    %353 = vector.extract_strided_slice %351 {offsets = [0, 0], sizes = [2, 32], strides = [1, 1]} : vector<2x96xf32> to vector<2x32xf32>
    %354 = arith.addf %352, %353 : vector<2x32xf32>
    %355 = arith.negf %354 : vector<2x32xf32>
    %356 = math.exp %355 : vector<2x32xf32>
    %cst_76 = arith.constant 1.000000e+00 : f32
    %357 = vector.broadcast %cst_76 : f32 to vector<2x32xf32>
    %358 = arith.addf %357, %356 : vector<2x32xf32>
    %359 = arith.divf %357, %358 : vector<2x32xf32>
    %360 = vector.extract_strided_slice %349 {offsets = [0, 32], sizes = [2, 32], strides = [1, 1]} : vector<2x96xf32> to vector<2x32xf32>
    %361 = vector.extract_strided_slice %351 {offsets = [0, 32], sizes = [2, 32], strides = [1, 1]} : vector<2x96xf32> to vector<2x32xf32>
    %362 = arith.addf %360, %361 : vector<2x32xf32>
    %363 = arith.negf %362 : vector<2x32xf32>
    %364 = math.exp %363 : vector<2x32xf32>
    %cst_77 = arith.constant 1.000000e+00 : f32
    %365 = vector.broadcast %cst_77 : f32 to vector<2x32xf32>
    %366 = arith.addf %365, %364 : vector<2x32xf32>
    %367 = arith.divf %365, %366 : vector<2x32xf32>
    %368 = vector.extract_strided_slice %349 {offsets = [0, 64], sizes = [2, 32], strides = [1, 1]} : vector<2x96xf32> to vector<2x32xf32>
    %369 = vector.extract_strided_slice %351 {offsets = [0, 64], sizes = [2, 32], strides = [1, 1]} : vector<2x96xf32> to vector<2x32xf32>
    %370 = arith.mulf %359, %369 : vector<2x32xf32>
    %371 = arith.addf %368, %370 : vector<2x32xf32>
    %372 = math.tanh %371 : vector<2x32xf32>
    %cst_78 = arith.constant 1.000000e+00 : f32
    %373 = vector.broadcast %cst_78 : f32 to vector<2x32xf32>
    %374 = arith.subf %373, %367 : vector<2x32xf32>
    %375 = arith.mulf %374, %372 : vector<2x32xf32>
    %376 = arith.mulf %367, %348 : vector<2x32xf32>
    %377 = arith.addf %375, %376 : vector<2x32xf32>
    %378 = vector.extract_strided_slice %256 {offsets = [8, 0], sizes = [2, 96], strides = [1, 1]} : vector<16x96xf32> to vector<2x96xf32>
    %cst_79 = arith.constant dense<0.000000e+00> : vector<2x96xf32>
    %379 = tpu.matmul %377, %257, %cst_79 {dimension_numbers = #tpu.dot_dimension_numbers<[1], [0], [0], [1], [0, 0, 1, 1], [], []>} : vector<2x32xf32>, vector<32x96xf32>, vector<2x96xf32> -> vector<2x96xf32>
    %380 = arith.addf %379, %260 : vector<2x96xf32>
    %381 = vector.extract_strided_slice %378 {offsets = [0, 0], sizes = [2, 32], strides = [1, 1]} : vector<2x96xf32> to vector<2x32xf32>
    %382 = vector.extract_strided_slice %380 {offsets = [0, 0], sizes = [2, 32], strides = [1, 1]} : vector<2x96xf32> to vector<2x32xf32>
    %383 = arith.addf %381, %382 : vector<2x32xf32>
    %384 = arith.negf %383 : vector<2x32xf32>
    %385 = math.exp %384 : vector<2x32xf32>
    %cst_80 = arith.constant 1.000000e+00 : f32
    %386 = vector.broadcast %cst_80 : f32 to vector<2x32xf32>
    %387 = arith.addf %386, %385 : vector<2x32xf32>
    %388 = arith.divf %386, %387 : vector<2x32xf32>
    %389 = vector.extract_strided_slice %378 {offsets = [0, 32], sizes = [2, 32], strides = [1, 1]} : vector<2x96xf32> to vector<2x32xf32>
    %390 = vector.extract_strided_slice %380 {offsets = [0, 32], sizes = [2, 32], strides = [1, 1]} : vector<2x96xf32> to vector<2x32xf32>
    %391 = arith.addf %389, %390 : vector<2x32xf32>
    %392 = arith.negf %391 : vector<2x32xf32>
    %393 = math.exp %392 : vector<2x32xf32>
    %cst_81 = arith.constant 1.000000e+00 : f32
    %394 = vector.broadcast %cst_81 : f32 to vector<2x32xf32>
    %395 = arith.addf %394, %393 : vector<2x32xf32>
    %396 = arith.divf %394, %395 : vector<2x32xf32>
    %397 = vector.extract_strided_slice %378 {offsets = [0, 64], sizes = [2, 32], strides = [1, 1]} : vector<2x96xf32> to vector<2x32xf32>
    %398 = vector.extract_strided_slice %380 {offsets = [0, 64], sizes = [2, 32], strides = [1, 1]} : vector<2x96xf32> to vector<2x32xf32>
    %399 = arith.mulf %388, %398 : vector<2x32xf32>
    %400 = arith.addf %397, %399 : vector<2x32xf32>
    %401 = math.tanh %400 : vector<2x32xf32>
    %cst_82 = arith.constant 1.000000e+00 : f32
    %402 = vector.broadcast %cst_82 : f32 to vector<2x32xf32>
    %403 = arith.subf %402, %396 : vector<2x32xf32>
    %404 = arith.mulf %403, %401 : vector<2x32xf32>
    %405 = arith.mulf %396, %377 : vector<2x32xf32>
    %406 = arith.addf %404, %405 : vector<2x32xf32>
    %407 = vector.extract_strided_slice %256 {offsets = [10, 0], sizes = [2, 96], strides = [1, 1]} : vector<16x96xf32> to vector<2x96xf32>
    %cst_83 = arith.constant dense<0.000000e+00> : vector<2x96xf32>
    %408 = tpu.matmul %406, %257, %cst_83 {dimension_numbers = #tpu.dot_dimension_numbers<[1], [0], [0], [1], [0, 0, 1, 1], [], []>} : vector<2x32xf32>, vector<32x96xf32>, vector<2x96xf32> -> vector<2x96xf32>
    %409 = arith.addf %408, %260 : vector<2x96xf32>
    %410 = vector.extract_strided_slice %407 {offsets = [0, 0], sizes = [2, 32], strides = [1, 1]} : vector<2x96xf32> to vector<2x32xf32>
    %411 = vector.extract_strided_slice %409 {offsets = [0, 0], sizes = [2, 32], strides = [1, 1]} : vector<2x96xf32> to vector<2x32xf32>
    %412 = arith.addf %410, %411 : vector<2x32xf32>
    %413 = arith.negf %412 : vector<2x32xf32>
    %414 = math.exp %413 : vector<2x32xf32>
    %cst_84 = arith.constant 1.000000e+00 : f32
    %415 = vector.broadcast %cst_84 : f32 to vector<2x32xf32>
    %416 = arith.addf %415, %414 : vector<2x32xf32>
    %417 = arith.divf %415, %416 : vector<2x32xf32>
    %418 = vector.extract_strided_slice %407 {offsets = [0, 32], sizes = [2, 32], strides = [1, 1]} : vector<2x96xf32> to vector<2x32xf32>
    %419 = vector.extract_strided_slice %409 {offsets = [0, 32], sizes = [2, 32], strides = [1, 1]} : vector<2x96xf32> to vector<2x32xf32>
    %420 = arith.addf %418, %419 : vector<2x32xf32>
    %421 = arith.negf %420 : vector<2x32xf32>
    %422 = math.exp %421 : vector<2x32xf32>
    %cst_85 = arith.constant 1.000000e+00 : f32
    %423 = vector.broadcast %cst_85 : f32 to vector<2x32xf32>
    %424 = arith.addf %423, %422 : vector<2x32xf32>
    %425 = arith.divf %423, %424 : vector<2x32xf32>
    %426 = vector.extract_strided_slice %407 {offsets = [0, 64], sizes = [2, 32], strides = [1, 1]} : vector<2x96xf32> to vector<2x32xf32>
    %427 = vector.extract_strided_slice %409 {offsets = [0, 64], sizes = [2, 32], strides = [1, 1]} : vector<2x96xf32> to vector<2x32xf32>
    %428 = arith.mulf %417, %427 : vector<2x32xf32>
    %429 = arith.addf %426, %428 : vector<2x32xf32>
    %430 = math.tanh %429 : vector<2x32xf32>
    %cst_86 = arith.constant 1.000000e+00 : f32
    %431 = vector.broadcast %cst_86 : f32 to vector<2x32xf32>
    %432 = arith.subf %431, %425 : vector<2x32xf32>
    %433 = arith.mulf %432, %430 : vector<2x32xf32>
    %434 = arith.mulf %425, %406 : vector<2x32xf32>
    %435 = arith.addf %433, %434 : vector<2x32xf32>
    %436 = vector.extract_strided_slice %256 {offsets = [12, 0], sizes = [2, 96], strides = [1, 1]} : vector<16x96xf32> to vector<2x96xf32>
    %cst_87 = arith.constant dense<0.000000e+00> : vector<2x96xf32>
    %437 = tpu.matmul %435, %257, %cst_87 {dimension_numbers = #tpu.dot_dimension_numbers<[1], [0], [0], [1], [0, 0, 1, 1], [], []>} : vector<2x32xf32>, vector<32x96xf32>, vector<2x96xf32> -> vector<2x96xf32>
    %438 = arith.addf %437, %260 : vector<2x96xf32>
    %439 = vector.extract_strided_slice %436 {offsets = [0, 0], sizes = [2, 32], strides = [1, 1]} : vector<2x96xf32> to vector<2x32xf32>
    %440 = vector.extract_strided_slice %438 {offsets = [0, 0], sizes = [2, 32], strides = [1, 1]} : vector<2x96xf32> to vector<2x32xf32>
    %441 = arith.addf %439, %440 : vector<2x32xf32>
    %442 = arith.negf %441 : vector<2x32xf32>
    %443 = math.exp %442 : vector<2x32xf32>
    %cst_88 = arith.constant 1.000000e+00 : f32
    %444 = vector.broadcast %cst_88 : f32 to vector<2x32xf32>
    %445 = arith.addf %444, %443 : vector<2x32xf32>
    %446 = arith.divf %444, %445 : vector<2x32xf32>
    %447 = vector.extract_strided_slice %436 {offsets = [0, 32], sizes = [2, 32], strides = [1, 1]} : vector<2x96xf32> to vector<2x32xf32>
    %448 = vector.extract_strided_slice %438 {offsets = [0, 32], sizes = [2, 32], strides = [1, 1]} : vector<2x96xf32> to vector<2x32xf32>
    %449 = arith.addf %447, %448 : vector<2x32xf32>
    %450 = arith.negf %449 : vector<2x32xf32>
    %451 = math.exp %450 : vector<2x32xf32>
    %cst_89 = arith.constant 1.000000e+00 : f32
    %452 = vector.broadcast %cst_89 : f32 to vector<2x32xf32>
    %453 = arith.addf %452, %451 : vector<2x32xf32>
    %454 = arith.divf %452, %453 : vector<2x32xf32>
    %455 = vector.extract_strided_slice %436 {offsets = [0, 64], sizes = [2, 32], strides = [1, 1]} : vector<2x96xf32> to vector<2x32xf32>
    %456 = vector.extract_strided_slice %438 {offsets = [0, 64], sizes = [2, 32], strides = [1, 1]} : vector<2x96xf32> to vector<2x32xf32>
    %457 = arith.mulf %446, %456 : vector<2x32xf32>
    %458 = arith.addf %455, %457 : vector<2x32xf32>
    %459 = math.tanh %458 : vector<2x32xf32>
    %cst_90 = arith.constant 1.000000e+00 : f32
    %460 = vector.broadcast %cst_90 : f32 to vector<2x32xf32>
    %461 = arith.subf %460, %454 : vector<2x32xf32>
    %462 = arith.mulf %461, %459 : vector<2x32xf32>
    %463 = arith.mulf %454, %435 : vector<2x32xf32>
    %464 = arith.addf %462, %463 : vector<2x32xf32>
    %465 = vector.extract_strided_slice %256 {offsets = [14, 0], sizes = [2, 96], strides = [1, 1]} : vector<16x96xf32> to vector<2x96xf32>
    %cst_91 = arith.constant dense<0.000000e+00> : vector<2x96xf32>
    %466 = tpu.matmul %464, %257, %cst_91 {dimension_numbers = #tpu.dot_dimension_numbers<[1], [0], [0], [1], [0, 0, 1, 1], [], []>} : vector<2x32xf32>, vector<32x96xf32>, vector<2x96xf32> -> vector<2x96xf32>
    %467 = arith.addf %466, %260 : vector<2x96xf32>
    %468 = vector.extract_strided_slice %465 {offsets = [0, 0], sizes = [2, 32], strides = [1, 1]} : vector<2x96xf32> to vector<2x32xf32>
    %469 = vector.extract_strided_slice %467 {offsets = [0, 0], sizes = [2, 32], strides = [1, 1]} : vector<2x96xf32> to vector<2x32xf32>
    %470 = arith.addf %468, %469 : vector<2x32xf32>
    %471 = arith.negf %470 : vector<2x32xf32>
    %472 = math.exp %471 : vector<2x32xf32>
    %cst_92 = arith.constant 1.000000e+00 : f32
    %473 = vector.broadcast %cst_92 : f32 to vector<2x32xf32>
    %474 = arith.addf %473, %472 : vector<2x32xf32>
    %475 = arith.divf %473, %474 : vector<2x32xf32>
    %476 = vector.extract_strided_slice %465 {offsets = [0, 32], sizes = [2, 32], strides = [1, 1]} : vector<2x96xf32> to vector<2x32xf32>
    %477 = vector.extract_strided_slice %467 {offsets = [0, 32], sizes = [2, 32], strides = [1, 1]} : vector<2x96xf32> to vector<2x32xf32>
    %478 = arith.addf %476, %477 : vector<2x32xf32>
    %479 = arith.negf %478 : vector<2x32xf32>
    %480 = math.exp %479 : vector<2x32xf32>
    %cst_93 = arith.constant 1.000000e+00 : f32
    %481 = vector.broadcast %cst_93 : f32 to vector<2x32xf32>
    %482 = arith.addf %481, %480 : vector<2x32xf32>
    %483 = arith.divf %481, %482 : vector<2x32xf32>
    %484 = vector.extract_strided_slice %465 {offsets = [0, 64], sizes = [2, 32], strides = [1, 1]} : vector<2x96xf32> to vector<2x32xf32>
    %485 = vector.extract_strided_slice %467 {offsets = [0, 64], sizes = [2, 32], strides = [1, 1]} : vector<2x96xf32> to vector<2x32xf32>
    %486 = arith.mulf %475, %485 : vector<2x32xf32>
    %487 = arith.addf %484, %486 : vector<2x32xf32>
    %488 = math.tanh %487 : vector<2x32xf32>
    %cst_94 = arith.constant 1.000000e+00 : f32
    %489 = vector.broadcast %cst_94 : f32 to vector<2x32xf32>
    %490 = arith.subf %489, %483 : vector<2x32xf32>
    %491 = arith.mulf %490, %488 : vector<2x32xf32>
    %492 = arith.mulf %483, %464 : vector<2x32xf32>
    %493 = arith.addf %491, %492 : vector<2x32xf32>
    %c0_95 = arith.constant 0 : index
    %c0_96 = arith.constant 0 : index
    %494 = vector.load %arg9[%c0_95, %c0_96] : memref<32x32xf32, #tpu.memory_space<vmem>>, vector<32x32xf32>
    %cst_97 = arith.constant dense<0.000000e+00> : vector<2x32xf32>
    %495 = tpu.matmul %493, %494, %cst_97 {dimension_numbers = #tpu.dot_dimension_numbers<[1], [0], [0], [1], [0, 0, 1, 1], [], []>} : vector<2x32xf32>, vector<32x32xf32>, vector<2x32xf32> -> vector<2x32xf32>
    %c0_98 = arith.constant 0 : index
    %c0_99 = arith.constant 0 : index
    %496 = vector.load %arg10[%c0_98, %c0_99] : memref<1x32xf32, #tpu.memory_space<vmem>>, vector<1x32xf32>
    %497 = vector.broadcast %496 : vector<1x32xf32> to vector<2x32xf32>
    %498 = arith.addf %495, %497 : vector<2x32xf32>
    %499 = math.tanh %498 : vector<2x32xf32>
    %c0_100 = arith.constant 0 : index
    %c0_101 = arith.constant 0 : index
    %500 = vector.load %arg11[%c0_100, %c0_101] : memref<2x32xf32, #tpu.memory_space<vmem>>, vector<2x32xf32>
    tpu.vector_store %arg11[%c0_100, %c0_101], %499 {strides = array<i32>} : memref<2x32xf32, #tpu.memory_space<vmem>>, vector<2x32xf32>,
    return
  }
}

</mosaic_0001>

<bundles_post_ra>
// kernel: encoder_rnn_forward.1
= control target key start
LH: loop header
LB: loop body
LE: loop exit
PB: predicated region body
PF: predicated region fallthrough
CT: control target
= control target key end

     0   :  { %v2660_v3 = vmov 0.0|0.0   ;;  %vm2661_vm0 = vmmov 0   ;;  %v2662_v8 = vmov 0.0   ;;  %vm54_vm1 = vcmask 392192   ;;  %s3116_s0 = inlined_call_operand.vmem [shape: f32[16,48], index: 0, kind: input, shape index: {}]   ;;  %s3117_s1 = inlined_call_operand.vmem [shape: f32[48,96], index: 1, kind: input, shape index: {}]   ;;  %s3118_s2 = inlined_call_operand.vmem [shape: f32[32,96], index: 2, kind: input, shape index: {}]   ;;  %s3119_s3 = inlined_call_operand.vmem [shape: f32[1,96], index: 3, kind: input, shape index: {}]   ;;  %s3120_s4 = inlined_call_operand.vmem [shape: f32[1,96], index: 4, kind: input, shape index: {}]   ;;  %s3121_s5 = inlined_call_operand.vmem [shape: f32[32,96], index: 5, kind: input, shape index: {}]   ;;  %s3122_s6 = inlined_call_operand.vmem [shape: f32[32,96], index: 6, kind: input, shape index: {}]   ;;  %s3123_s7 = inlined_call_operand.vmem [shape: f32[1,96], index: 7, kind: input, shape index: {}]   ;;  %s3124_s8 = inlined_call_operand.vmem [shape: f32[1,96], index: 8, kind: input, shape index: {}]   ;;  %s3125_s9 = inlined_call_operand.vmem [shape: f32[32,32], index: 9, kind: input, shape index: {}]   ;;  %s3126_s10 = inlined_call_operand.vmem [shape: f32[1,32], index: 10, kind: input, shape index: {}]   ;;  %s3127_s11 = inlined_call_operand.hbm [shape: f32[2,32], index: 11, kind: output, shape index: {}]  }
   0x1   :  { %v41_v0 = vld [vmem:[%s3117_s1] sm:$0xff]  ;;  %v42_v1 = vld [vmem:[%s3117_s1 + $0x8] sm:$0xff]  ;;  %2422 = vmatprep.subr.bf16.mxu1 %v2660_v3  ;;  %v43_v6 = vld [vmem:[%s3117_s1 + $0x10] sm:$0xff]  ;;  %2220 = vmatprep.mubr.msk.f32.mxu1 %vm2661_vm0, %v2662_v8 }
   0x2   :  { %v136_v2 = vld [vmem:[%s3118_s2] sm:$0xff]  ;;  %v2410_v4 = vpack.c.bf16 %v42_v1, %v41_v0  ;;  %v137_v5 = vld [vmem:[%s3118_s2 + $0x8] sm:$0xff]  ;;  %v44_v7 = vld [vmem:[%s3117_s1 + $0x18] sm:$0xff] }
   0x3   :  { %v2747_v9 = vpack.c.bf16 %v137_v5, %v136_v2  ;;  %v2414_v10 = vpack.c.bf16 %v44_v7, %v43_v6  ;;  %v138_v11 = vld [vmem:[%s3118_s2 + $0x10] sm:$0xff]  ;;  %v139_v12 = vld [vmem:[%s3118_s2 + $0x18] sm:$0xff]  ;;  %v45_v13 = vld [vmem:[%s3117_s1 + $0x20] sm:$0xff] }
   0x4   :  { %2411 = vmatprep.subr.bf16.mxu0 %v2410_v4  ;;  %v46_v14 = vld [vmem:[%s3117_s1 + $0x28] sm:$0xff]  ;;  %v39_v15 = vld [vmem:[%s3116_s0] sm:$0xff]  ;;  %v2765_v16 = vpack.c.bf16 %v139_v12, %v138_v11 }
   0x5   :  { %2424 = vmatpush3.bf16.msra.mxu1 %v2747_v9  ;;  %2413 = vmatpush3.bf16.msra.mxu0 %v2410_v4 }
   0x6   :  { %16 = vsyncpa [#allocation4], 0  ;;  %2425 = vmatprep.subr.bf16.mxu1 %v2660_v3  ;;  %2415 = vmatprep.subr.bf16.mxu0 %v2414_v10  ;;  %v2418_v17 = vpack.c.bf16 %v46_v14, %v45_v13  ;;  %v40_v18 = vld [vmem:[%s3116_s0 + $0x8] sm:$0xff]  ;;  %v2792_v19 = vld [vmem:[%s3120_s4] ss:$0 sm:$0xff]  ;;  %s2663_s21 = smov 64  }
   0x7   :  { %2209 = vmatprep.mubr.msk.f32.mxu0 %vm54_vm1, %v39_v15  ;;  %v2058_v24 = vld [vmem:[%s3119_s3] ss:$0 sm:$0xff]  ;;  %s2664_s3 = smov 96   ;;  %vm251_vm2 = vcmask 254976   ;;  %vm147_vm3 = vcmask 261120   ;;  %vm359_vm4 = vcmask 257026  }
   0x8   :  { %vm581_vm5 = vcmask 261126   ;;  %vm470_vm6 = vcmask 259076   ;;  %s2665_s25 = smov [#allocation3]  }
   0x9   :  { %2427 = vmatpush3.bf16.msra.mxu1 %v2765_v16  ;;  %2417 = vmatpush3.bf16.msra.mxu0 %v2414_v10  ;;  %s2050_s26 = sshll.u32 %s2665_s25, 4  ;;  %s2051_s26 = int_to_ptr.vmem [resolvable:$true] %s2050_s26 }
   0xa   :  { %2419 = vmatprep.subr.bf16.mxu0 %v2418_v17  ;;  %2428 = vmatprep.subr.bf16.mxu1 %v2660_v3  ;;  %s2636_s27 = scalar_lea.vmem %s2051_s26, 32  ;;  %p2641_p1 = scmp.lt.s32.totalorder %s2051_s26, %s2051_s26 }
   0xb   :  { %p2637_p0 = scmp.ne.s32.totalorder %s2051_s26, %s2636_s27  ;;  %p2642_p2 = scmp.lt.s32.totalorder %s2636_s27, %s2636_s27 }
   0xc   :  { %2221 = vmatmul.mubr.f32.vlgmr.msra.gmra.mrb[0].mxu1 %v2662_v8 }
   0xd   :  { %2421 = vmatpush3.bf16.msra.mxu0 %v2418_v17  ;;  %2430 = vmatpush3.bf16.msra.mxu1 %v2747_v9  ;;  %p2643_p3 = por %p2642_p2, %p2641_p1 }
   0xe   :  { %2431 = vmatprep.subr.bf16.mxu1 %v2660_v3  ;;  %2231 = vmatprep.mubr.msk.f32.mxu1 %vm2661_vm0, %v2662_v8 }
   0xf   :  { %2434 = vmatprep.subr.bf16.mxu0 %v2660_v3  ;;  %p2644_p4 = pnand %p2643_p3, %p2637_p0 }
  0x10   :  { %2210 = vmatmul.mubr.msk.f32.vlgmr.msra.gmra.mrb[0].mxu0 %vm54_vm1, %v40_v18 }
  0x11   :  { %2433 = vmatpush3.bf16.msra.mxu1 %v2765_v16  ;;  %2436 = vmatpush3.bf16.msra.mxu0 %v2747_v9 }
  0x12   :  { %2437 = vmatprep.subr.bf16.mxu0 %v2660_v3  ;;  %2242 = vmatprep.mubr.msk.f32.mxu0 %vm2661_vm0, %v2662_v8 }
  0x13   :  { %2440 = vmatprep.subr.bf16.mxu1 %v2660_v3 }
  0x15   :  { %2439 = vmatpush3.bf16.msra.mxu0 %v2765_v16 }
  0x16   :  { %2446 = vmatprep.subr.bf16.mxu0 %v2660_v3 }
  0xdf   :  { %v217_v20 = vpop.f32.mrb[0].mxu1 }
  0xe0   :  { %v218_v21 = vadd.f32 %v2792_v19, %v217_v20  ;;  %v2222_v22 = vpop.f32.mrb[1].mxu1 }
  0xe2   :  { %229 = vrot.lane.b32.xlu0 %v218_v21, %s2663_s21 }
  0xe3   :  { %v2211_v23 = vpop.f32.mrb[0].mxu0 }
  0xe4   :  { %v2799_v25 = vadd.f32 %v2211_v23, %v2058_v24  ;;  %v127_v26 = vpop.f32.mrb[1].mxu0 }
  0xe5   :  { %v2801_v27 = vadd.f32 %v2058_v24, %v127_v26 }
  0xe7   :  { %v221_v28 = vadd.f32 %v218_v21, %v2801_v27 }
  0xe9   :  { %v2062_v29 = vmul.f32 -1.442695, %v221_v28 }
  0xeb   :  { %2538 = vpow2.f32 %v2062_v29 }
  0xf5   :  { %v2539_v30 = vpop.eup %2538 }
  0xf6   :  { %v225_v31 = vadd.f32 1.0, %v2539_v30 }
  0xf8   :  { %2540 = vrcp.f32 %v225_v31 }
 0x102   :  { %v2541_v32 = vpop.eup %2540 }
 0x103   :  { %v239_v38 = vsub.f32 1.0, %v2541_v32  ;;  %v245_v40 = vmul.f32 0.0, %v2541_v32 }
 0x154   :  { %v230_v33 = vpop.permute.xlu0 %229 }
 0x155   :  { %v232_v34 = vmul.f32 %v2541_v32, %v230_v33 }
 0x157   :  { %234 = vrot.lane.b32.xlu0 %v232_v34, %s2663_s21 }
 0x1c9   :  { %v235_v35 = vpop.permute.xlu0 %234 }
 0x1ca   :  { %v237_v36 = vadd.f32 %v235_v35, %v2801_v27 }
 0x1cc   :  { %2542 = vtanh.f32 %v237_v36 }
 0x1d6   :  { %v2543_v37 = vpop.eup %2542 }
 0x1d7   :  { %241 = vrot.lane.b32.xlu1 %v2543_v37, %s2664_s3 }
 0x249   :  { %v242_v39 = vpop.permute.xlu1 %241 }
 0x24a   :  { %v244_v41 = vmul.f32 %v242_v39, %v239_v38 }
 0x24c   :  { %v246_v42 = vadd.f32 %v245_v40, %v244_v41 }
 0x24e   :  { %248 = vrot.lane.b32.xlu1 %v246_v42, %s2664_s3  ;;  %v351_v58 = vrot.slane %v246_v42, 6 }
 0x2c0   :  { %v249_v43 = vpop.permute.xlu1 %248 }
 0x2c1   :  { %252 = vst.msk [vmem:[#allocation2] sm:$0x3] %vm251_vm2, %v249_v43  ;;  %2232 = vmatmul.mubr.msk.f32.vlgmr.msra.gmra.mrb[2].mxu1 %vm147_vm3, %v249_v43 }
 0x2c2   :  { %2442 = vmatpush3.bf16.msra.mxu1 %v2747_v9  ;;  %2253 = vmatprep.mubr.msk.f32.mxu1 %vm2661_vm0, %v2662_v8 }
 0x2c3   :  { %2443 = vmatprep.subr.bf16.mxu1 %v2660_v3 }
 0x2c6   :  { %2445 = vmatpush3.bf16.msra.mxu1 %v2765_v16 }
 0x2c7   :  { %2452 = vmatprep.subr.bf16.mxu1 %v2660_v3 }
 0x394   :  { %v321_v44 = vpop.f32.mrb[2].mxu1 }
 0x395   :  { %v322_v45 = vadd.f32 %v2792_v19, %v321_v44  ;;  %v2233_v46 = vpop.f32.mrb[3].mxu1 }
 0x397   :  { %v326_v47 = vrot.slane %v322_v45, 6 }
 0x399   :  { %335 = vrot.lane.b32.xlu0 %v326_v47, %s2663_s21  ;;  %v328_v48 = vadd.f32 %v326_v47, %v2801_v27 }
 0x39b   :  { %v2064_v49 = vmul.f32 -1.442695, %v328_v48 }
 0x39d   :  { %2544 = vpow2.f32 %v2064_v49 }
 0x3a7   :  { %v2545_v50 = vpop.eup %2544 }
 0x3a8   :  { %v332_v51 = vadd.f32 1.0, %v2545_v50 }
 0x3aa   :  { %2546 = vrcp.f32 %v332_v51 }
 0x3b4   :  { %v2547_v52 = vpop.eup %2546 }
 0x3b5   :  { %v345_v59 = vsub.f32 1.0, %v2547_v52  ;;  %v353_v62 = vmul.f32 %v2547_v52, %v351_v58 }
 0x40b   :  { %v336_v53 = vpop.permute.xlu0 %335 }
 0x40c   :  { %v338_v54 = vmul.f32 %v2547_v52, %v336_v53 }
 0x40e   :  { %340 = vrot.lane.b32.xlu1 %v338_v54, %s2663_s21 }
 0x480   :  { %v341_v55 = vpop.permute.xlu1 %340 }
 0x481   :  { %v343_v56 = vadd.f32 %v341_v55, %v2801_v27 }
 0x483   :  { %2548 = vtanh.f32 %v343_v56 }
 0x48d   :  { %v2549_v57 = vpop.eup %2548 }
 0x48e   :  { %347 = vrot.lane.b32.xlu0 %v2549_v57, %s2664_s3 }
 0x500   :  { %v348_v60 = vpop.permute.xlu0 %347 }
 0x501   :  { %v350_v61 = vmul.f32 %v348_v60, %v345_v59 }
 0x503   :  { %v2822_v63 = vadd.f32 %v353_v62, %v350_v61 }
 0x505   :  { %v361_v0 = vrot.slane %v2822_v63, 2  ;;  %v462_v22 = vrot.slane %v2822_v63, 6 }
 0x507   :  { %362 = vrot.lane.b32.xlu1 %v361_v0, %s2664_s3 }
 0x579   :  { %v363_v1 = vpop.permute.xlu1 %362 }
 0x57a   :  { %2243 = vmatmul.mubr.msk.f32.vlgmr.msra.gmra.mrb[2].mxu0 %vm147_vm3, %v363_v1 }
 0x57b   :  { %2448 = vmatpush3.bf16.msra.mxu0 %v2747_v9  ;;  %2264 = vmatprep.mubr.msk.f32.mxu0 %vm2661_vm0, %v2662_v8 }
 0x57c   :  { %2449 = vmatprep.subr.bf16.mxu0 %v2660_v3 }
 0x57f   :  { %2451 = vmatpush3.bf16.msra.mxu0 %v2765_v16 }
 0x580   :  { %2458 = vmatprep.subr.bf16.mxu0 %v2660_v3 }
 0x64d   :  { %v432_v2 = vpop.f32.mrb[2].mxu0 }
 0x64e   :  { %v433_v4 = vadd.f32 %v2792_v19, %v432_v2  ;;  %v2244_v5 = vpop.f32.mrb[3].mxu0 }
 0x650   :  { %v437_v6 = vrot.slane %v433_v4, 4 }
 0x652   :  { %446 = vrot.lane.b32.xlu0 %v437_v6, %s2663_s21  ;;  %v439_v7 = vadd.f32 %v437_v6, %v2801_v27 }
 0x654   :  { %v2066_v10 = vmul.f32 -1.442695, %v439_v7 }
 0x656   :  { %2550 = vpow2.f32 %v2066_v10 }
 0x660   :  { %v2551_v11 = vpop.eup %2550 }
 0x661   :  { %v443_v12 = vadd.f32 1.0, %v2551_v11 }
 0x663   :  { %2552 = vrcp.f32 %v443_v12 }
 0x66d   :  { %v2553_v13 = vpop.eup %2552 }
 0x66e   :  { %v456_v21 = vsub.f32 1.0, %v2553_v13  ;;  %v464_v24 = vmul.f32 %v2553_v13, %v462_v22 }
 0x6c4   :  { %v447_v14 = vpop.permute.xlu0 %446 }
 0x6c5   :  { %v449_v15 = vmul.f32 %v2553_v13, %v447_v14 }
 0x6c7   :  { %451 = vrot.lane.b32.xlu1 %v449_v15, %s2663_s21 }
 0x739   :  { %v452_v17 = vpop.permute.xlu1 %451 }
 0x73a   :  { %v454_v18 = vadd.f32 %v452_v17, %v2801_v27 }
 0x73c   :  { %2554 = vtanh.f32 %v454_v18 }
 0x746   :  { %v2555_v20 = vpop.eup %2554 }
 0x747   :  { %458 = vrot.lane.b32.xlu0 %v2555_v20, %s2664_s3 }
 0x7b9   :  { %v459_v23 = vpop.permute.xlu0 %458 }
 0x7ba   :  { %v461_v26 = vmul.f32 %v459_v23, %v456_v21 }
 0x7bc   :  { %v2840_v28 = vadd.f32 %v464_v24, %v461_v26 }
 0x7be   :  { %v472_v29 = vrot.slane %v2840_v28, 4  ;;  %v573_v46 = vrot.slane %v2840_v28, 6 }
 0x7c0   :  { %473 = vrot.lane.b32.xlu1 %v472_v29, %s2664_s3 }
 0x832   :  { %v474_v30 = vpop.permute.xlu1 %473 }
 0x833   :  { %2254 = vmatmul.mubr.msk.f32.vlgmr.msra.gmra.mrb[4].mxu1 %vm147_vm3, %v474_v30 }
 0x834   :  { %2454 = vmatpush3.bf16.msra.mxu1 %v2747_v9  ;;  %2275 = vmatprep.mubr.msk.f32.mxu1 %vm2661_vm0, %v2662_v8 }
 0x835   :  { %2455 = vmatprep.subr.bf16.mxu1 %v2660_v3 }
 0x838   :  { %2457 = vmatpush3.bf16.msra.mxu1 %v2765_v16 }
 0x839   :  { %2464 = vmatprep.subr.bf16.mxu1 %v2660_v3 }
 0x906   :  { %v543_v31 = vpop.f32.mrb[4].mxu1 }
 0x907   :  { %v544_v32 = vadd.f32 %v2792_v19, %v543_v31  ;;  %v2255_v33 = vpop.f32.mrb[5].mxu1 }
 0x909   :  { %v548_v34 = vrot.slane %v544_v32, 2 }
 0x90b   :  { %557 = vrot.lane.b32.xlu0 %v548_v34, %s2663_s21  ;;  %v550_v35 = vadd.f32 %v548_v34, %v2801_v27 }
 0x90d   :  { %v2068_v36 = vmul.f32 -1.442695, %v550_v35 }
 0x90f   :  { %2556 = vpow2.f32 %v2068_v36 }
 0x919   :  { %v2557_v37 = vpop.eup %2556 }
 0x91a   :  { %v554_v38 = vadd.f32 1.0, %v2557_v37 }
 0x91c   :  { %2558 = vrcp.f32 %v554_v38 }
 0x926   :  { %v2559_v39 = vpop.eup %2558 }
 0x927   :  { %v567_v45 = vsub.f32 1.0, %v2559_v39  ;;  %v575_v48 = vmul.f32 %v2559_v39, %v573_v46 }
 0x97d   :  { %v558_v40 = vpop.permute.xlu0 %557 }
 0x97e   :  { %v560_v41 = vmul.f32 %v2559_v39, %v558_v40 }
 0x980   :  { %562 = vrot.lane.b32.xlu1 %v560_v41, %s2663_s21 }
 0x9f2   :  { %v563_v42 = vpop.permute.xlu1 %562 }
 0x9f3   :  { %v565_v43 = vadd.f32 %v563_v42, %v2801_v27 }
 0x9f5   :  { %2560 = vtanh.f32 %v565_v43 }
 0x9ff   :  { %v2561_v44 = vpop.eup %2560 }
 0xa00   :  { %569 = vrot.lane.b32.xlu0 %v2561_v44, %s2664_s3 }
 0xa72   :  { %v570_v47 = vpop.permute.xlu0 %569 }
 0xa73   :  { %v572_v49 = vmul.f32 %v570_v47, %v567_v45 }
 0xa75   :  { %v2858_v50 = vadd.f32 %v575_v48, %v572_v49 }
 0xa77   :  { %v583_v51 = vrot.slane %v2858_v50, 6 }
 0xa79   :  { %584 = vrot.lane.b32.xlu1 %v583_v51, %s2664_s3 }
 0xaeb   :  { %v585_v52 = vpop.permute.xlu1 %584 }
 0xaec   :  { %2265 = vmatmul.mubr.msk.f32.vlgmr.msra.gmra.mrb[4].mxu0 %vm147_vm3, %v585_v52 }
 0xaed   :  { %2460 = vmatpush3.bf16.msra.mxu0 %v2747_v9  ;;  %2286 = vmatprep.mubr.msk.f32.mxu0 %vm2661_vm0, %v2662_v8 }
 0xaee   :  { %2461 = vmatprep.subr.bf16.mxu0 %v2660_v3 }
 0xaf1   :  { %2463 = vmatpush3.bf16.msra.mxu0 %v2765_v16 }
 0xbbf   :  { %v654_v27 = vpop.f32.mrb[4].mxu0 }
 0xbc0   :  { %v655_v53 = vadd.f32 %v2792_v19, %v654_v27  ;;  %v2266_v54 = vpop.f32.mrb[5].mxu0 }
 0xbc2   :  { %666 = vrot.lane.b32.xlu0 %v655_v53, %s2663_s21  ;;  %v658_v55 = vadd.f32 %v655_v53, %v2799_v25 }
 0xbc4   :  { %v2070_v56 = vmul.f32 -1.442695, %v658_v55 }
 0xbc6   :  { %2562 = vpow2.f32 %v2070_v56 }
 0xbd0   :  { %v2563_v57 = vpop.eup %2562 }
 0xbd1   :  { %v662_v58 = vadd.f32 1.0, %v2563_v57 }
 0xbd3   :  { %2564 = vrcp.f32 %v662_v58 }
 0xbdd   :  { %v2565_v59 = vpop.eup %2564 }
 0xbde   :  { %v676_v2 = vsub.f32 1.0, %v2565_v59  ;;  %v683_v5 = vmul.f32 %v2565_v59, %v583_v51 }
 0xc34   :  { %v667_v60 = vpop.permute.xlu0 %666 }
 0xc35   :  { %v669_v61 = vmul.f32 %v2565_v59, %v667_v60 }
 0xc37   :  { %671 = vrot.lane.b32.xlu1 %v669_v61, %s2663_s21 }
 0xca9   :  { %v672_v62 = vpop.permute.xlu1 %671 }
 0xcaa   :  { %v674_v0 = vadd.f32 %v672_v62, %v2799_v25 }
 0xcac   :  { %2566 = vtanh.f32 %v674_v0 }
 0xcb6   :  { %v2567_v1 = vpop.eup %2566 }
 0xcb7   :  { %678 = vrot.lane.b32.xlu0 %v2567_v1, %s2664_s3 }
 0xd29   :  { %v679_v4 = vpop.permute.xlu0 %678 }
 0xd2a   :  { %v681_v6 = vmul.f32 %v679_v4, %v676_v2 }
 0xd2c   :  { %v684_v7 = vadd.f32 %v683_v5, %v681_v6 }
 0xd2e   :  { %686 = vrot.lane.b32.xlu1 %v684_v7, %s2664_s3  ;;  %v788_v26 = vrot.slane %v684_v7, 6 }
 0xda0   :  { %v687_v10 = vpop.permute.xlu1 %686 }
 0xda1   :  { %689 = vst.msk [vmem:[#allocation2 + $0x8] sm:$0x3] %vm251_vm2, %v687_v10  ;;  %2276 = vmatmul.mubr.msk.f32.vlgmr.msra.gmra.mrb[6].mxu1 %vm147_vm3, %v687_v10 }
 0xda2   :  { %2466 = vmatpush3.bf16.msra.mxu1 %v2747_v9  ;;  %2297 = vmatprep.mubr.msk.f32.mxu1 %vm2661_vm0, %v2662_v8 }
 0xda3   :  { %2467 = vmatprep.subr.bf16.mxu1 %v2660_v3 }
 0xda6   :  { %2469 = vmatpush3.bf16.msra.mxu1 %v2765_v16 }
 0xda7   :  { %2478 = vmatprep.subr.bf16.mxu1 %v2660_v3 }
 0xe74   :  { %v758_v11 = vpop.f32.mrb[6].mxu1 }
 0xe75   :  { %v759_v12 = vadd.f32 %v2792_v19, %v758_v11  ;;  %v2277_v13 = vpop.f32.mrb[7].mxu1 }
 0xe76   :  { %v1113_v13 = vld [vmem:[%s3122_s6 + $0x10] sm:$0xff] }
 0xe77   :  { %v763_v14 = vrot.slane %v759_v12, 6 }
 0xe79   :  { %772 = vrot.lane.b32.xlu0 %v763_v14, %s2663_s21  ;;  %v765_v15 = vadd.f32 %v763_v14, %v2799_v25 }
 0xe7b   :  { %v2072_v17 = vmul.f32 -1.442695, %v765_v15  ;;  %v1114_v15 = vld [vmem:[%s3122_s6 + $0x18] sm:$0xff] }
 0xe7d   :  { %2568 = vpow2.f32 %v2072_v17  ;;  %v2938_v17 = vpack.c.bf16 %v1114_v15, %v1113_v13 }
 0xe87   :  { %v2569_v9 = vpop.eup %2568 }
 0xe88   :  { %v769_v18 = vadd.f32 1.0, %v2569_v9  ;;  %v1020_v9 = vld [vmem:[%s3121_s5 + $0x8] sm:$0xff] }
 0xe8a   :  { %2570 = vrcp.f32 %v769_v18 }
 0xe94   :  { %v2571_v20 = vpop.eup %2570 }
 0xe95   :  { %v782_v29 = vsub.f32 1.0, %v2571_v20  ;;  %v790_v32 = vmul.f32 %v2571_v20, %v788_v26 }
 0xeeb   :  { %v773_v21 = vpop.permute.xlu0 %772 }
 0xeec   :  { %v775_v22 = vmul.f32 %v2571_v20, %v773_v21  ;;  %v1021_v20 = vld [vmem:[%s3121_s5 + $0x10] sm:$0xff]  ;;  %v1022_v21 = vld [vmem:[%s3121_s5 + $0x18] sm:$0xff] }
 0xeee   :  { %777 = vrot.lane.b32.xlu1 %v775_v22, %s2663_s21  ;;  %v2474_v22 = vpack.c.bf16 %v1022_v21, %v1021_v20 }
 0xf60   :  { %v778_v16 = vpop.permute.xlu1 %777 }
 0xf61   :  { %v780_v23 = vadd.f32 %v778_v16, %v2799_v25 }
 0xf63   :  { %2572 = vtanh.f32 %v780_v23 }
 0xf6d   :  { %v2573_v24 = vpop.eup %2572 }
 0xf6e   :  { %784 = vrot.lane.b32.xlu0 %v2573_v24, %s2664_s3 }
 0xfe0   :  { %v785_v30 = vpop.permute.xlu0 %784 }
 0xfe1   :  { %v787_v31 = vmul.f32 %v785_v30, %v782_v29 }
 0xfe3   :  { %v2889_v33 = vadd.f32 %v790_v32, %v787_v31 }
 0xfe5   :  { %v797_v34 = vrot.slane %v2889_v33, 2  ;;  %v898_v52 = vrot.slane %v2889_v33, 6 }
 0xfe7   :  { %798 = vrot.lane.b32.xlu1 %v797_v34, %s2664_s3  ;;  %v2975_v34 = vld [vmem:[%s3124_s8] ss:$0 sm:$0xff] }
0x1059   :  { %v799_v35 = vpop.permute.xlu1 %798 }
0x105a   :  { %2287 = vmatmul.mubr.msk.f32.vlgmr.msra.gmra.mrb[6].mxu0 %vm147_vm3, %v799_v35 }
0x112d   :  { %v868_v36 = vpop.f32.mrb[6].mxu0 }
0x112e   :  { %v869_v37 = vadd.f32 %v2792_v19, %v868_v36  ;;  %v2288_v38 = vpop.f32.mrb[7].mxu0 }
0x1130   :  { %v873_v39 = vrot.slane %v869_v37, 4 }
0x1132   :  { %882 = vrot.lane.b32.xlu0 %v873_v39, %s2663_s21  ;;  %v875_v40 = vadd.f32 %v873_v39, %v2799_v25 }
0x1134   :  { %v2074_v41 = vmul.f32 -1.442695, %v875_v40  ;;  %v2077_v40 = vld [vmem:[%s3123_s7] ss:$0 sm:$0xff] }
0x1136   :  { %2574 = vpow2.f32 %v2074_v41 }
0x1140   :  { %v2575_v42 = vpop.eup %2574 }
0x1141   :  { %v879_v43 = vadd.f32 1.0, %v2575_v42 }
0x1143   :  { %2576 = vrcp.f32 %v879_v43 }
0x114d   :  { %v2577_v44 = vpop.eup %2576 }
0x114e   :  { %v892_v51 = vsub.f32 1.0, %v2577_v44  ;;  %v900_v53 = vmul.f32 %v2577_v44, %v898_v52 }
0x11a4   :  { %v883_v45 = vpop.permute.xlu0 %882 }
0x11a5   :  { %v885_v46 = vmul.f32 %v2577_v44, %v883_v45 }
0x11a7   :  { %887 = vrot.lane.b32.xlu1 %v885_v46, %s2663_s21 }
0x1219   :  { %v888_v47 = vpop.permute.xlu1 %887 }
0x121a   :  { %v890_v48 = vadd.f32 %v888_v47, %v2799_v25 }
0x121c   :  { %2578 = vtanh.f32 %v890_v48 }
0x1226   :  { %v2579_v49 = vpop.eup %2578 }
0x1227   :  { %894 = vrot.lane.b32.xlu0 %v2579_v49, %s2664_s3 }
0x1299   :  { %v895_v27 = vpop.permute.xlu0 %894 }
0x129a   :  { %v897_v54 = vmul.f32 %v895_v27, %v892_v51 }
0x129c   :  { %v2901_v55 = vadd.f32 %v900_v53, %v897_v54 }
0x129e   :  { %v907_v56 = vrot.slane %v2901_v55, 4  ;;  %v1008_v23 = vrot.slane %v2901_v55, 6 }
0x12a0   :  { %908 = vrot.lane.b32.xlu1 %v907_v56, %s2664_s3 }
0x1312   :  { %v909_v57 = vpop.permute.xlu1 %908 }
0x1313   :  { %2298 = vmatmul.mubr.msk.f32.vlgmr.msra.gmra.mrb[8].mxu1 %vm147_vm3, %v909_v57 }
0x1314   :  { %2319 = vmatprep.mubr.msk.f32.mxu1 %vm2661_vm0, %v2662_v8 }
0x13e6   :  { %v978_v58 = vpop.f32.mrb[8].mxu1 }
0x13e7   :  { %v979_v59 = vadd.f32 %v2792_v19, %v978_v58  ;;  %v2299_v60 = vpop.f32.mrb[9].mxu1 }
0x13e9   :  { %v983_v61 = vrot.slane %v979_v59, 2 }
0x13eb   :  { %992 = vrot.lane.b32.xlu0 %v983_v61, %s2663_s21  ;;  %v985_v62 = vadd.f32 %v983_v61, %v2799_v25 }
0x13ed   :  { %v2076_v0 = vmul.f32 -1.442695, %v985_v62 }
0x13ef   :  { %2580 = vpow2.f32 %v2076_v0 }
0x13f9   :  { %v2581_v1 = vpop.eup %2580 }
0x13fa   :  { %v989_v2 = vadd.f32 1.0, %v2581_v1 }
0x13fc   :  { %2582 = vrcp.f32 %v989_v2 }
0x1406   :  { %v2583_v4 = vpop.eup %2582 }
0x1407   :  { %v1002_v16 = vsub.f32 1.0, %v2583_v4  ;;  %v1010_v26 = vmul.f32 %v2583_v4, %v1008_v23 }
0x145d   :  { %v993_v5 = vpop.permute.xlu0 %992 }
0x145e   :  { %v995_v6 = vmul.f32 %v2583_v4, %v993_v5 }
0x1460   :  { %997 = vrot.lane.b32.xlu1 %v995_v6, %s2663_s21 }
0x1464   :  { %356 = vrot.lane.b32.xlu1 %v2822_v63, %s2664_s3 }
0x1468   :  { %578 = vrot.lane.b32.xlu1 %v2858_v50, %s2664_s3  ;;  %v1111_v50 = vld [vmem:[%s3122_s6] sm:$0xff] }
0x146c   :  { %903 = vrot.lane.b32.xlu1 %v2901_v55, %s2664_s3 }
0x14d2   :  { %v998_v19 = vpop.permute.xlu1 %997 }
0x14d3   :  { %v1000_v7 = vadd.f32 %v998_v19, %v2799_v25  ;;  %v1112_v25 = vld [vmem:[%s3122_s6 + $0x8] sm:$0xff] }
0x14d4   :  { %v2932_v14 = vpack.c.bf16 %v1112_v25, %v1111_v50 }
0x14d5   :  { %2584 = vtanh.f32 %v1000_v7 }
0x14d6   :  { %v357_v10 = vpop.permute.xlu1 %356  ;;  %2480 = vmatpush3.bf16.msra.mxu1 %v2932_v14 }
0x14d7   :  { %360 = vst.msk [vmem:[#allocation2] sm:$0xc] %vm359_vm4, %v357_v10  ;;  %2481 = vmatprep.subr.bf16.mxu1 %v2660_v3 }
0x14da   :  { %v579_v11 = vpop.permute.xlu1 %578  ;;  %2483 = vmatpush3.bf16.msra.mxu1 %v2938_v17 }
0x14db   :  { %582 = vst.msk [vmem:[#allocation2] sm:$0xc0] %vm581_vm5, %v579_v11  ;;  %2490 = vmatprep.subr.bf16.mxu1 %v2660_v3 }
0x14dd   :  { %2320 = vmatmul.mubr.f32.vlgmr.msra.gmra.mrb[10].mxu1 %v2662_v8 }
0x14de   :  { %v904_v63 = vpop.permute.xlu1 %903  ;;  %2492 = vmatpush3.bf16.msra.mxu1 %v2932_v14  ;;  %2341 = vmatprep.mubr.msk.f32.mxu1 %vm2661_vm0, %v2662_v8 }
0x14df   :  { %v2585_v12 = vpop.eup %2584  ;;  %906 = vst.msk [vmem:[#allocation2 + $0x8] sm:$0x30] %vm470_vm6, %v904_v63  ;;  %2493 = vmatprep.subr.bf16.mxu1 %v2660_v3 }
0x14e0   :  { %1004 = vrot.lane.b32.xlu0 %v2585_v12, %s2664_s3 }
0x14e2   :  { %2495 = vmatpush3.bf16.msra.mxu1 %v2938_v17 }
0x14e3   :  { %2502 = vmatprep.subr.bf16.mxu1 %v2660_v3 }
0x14e4   :  { %467 = vrot.lane.b32.xlu0 %v2840_v28, %s2664_s3  ;;  %v1019_v28 = vld [vmem:[%s3121_s5] sm:$0xff] }
0x14e5   :  { %v2470_v18 = vpack.c.bf16 %v1020_v9, %v1019_v28 }
0x14e7   :  { %2471 = vmatprep.subr.bf16.mxu0 %v2470_v18 }
0x14e8   :  { %793 = vrot.lane.b32.xlu0 %v2889_v33, %s2664_s3  ;;  %2473 = vmatpush3.bf16.msra.mxu0 %v2470_v18 }
0x14e9   :  { %2475 = vmatprep.subr.bf16.mxu0 %v2474_v22 }
0x14ec   :  { %2477 = vmatpush3.bf16.msra.mxu0 %v2474_v22 }
0x14ed   :  { %2484 = vmatprep.subr.bf16.mxu0 %v2660_v3 }
0x1552   :  { %v1005_v24 = vpop.permute.xlu0 %1004 }
0x1553   :  { %v1007_v29 = vmul.f32 %v1005_v24, %v1002_v16 }
0x1555   :  { %v1011_v30 = vadd.f32 %v1010_v26, %v1007_v29 }
0x1556   :  { %v468_v31 = vpop.permute.xlu0 %467 }
0x1557   :  { %471 = vst.msk [vmem:[#allocation2] sm:$0x30] %vm470_vm6, %v468_v31  ;;  %1013 = vrot.lane.b32.xlu0 %v1011_v30, %s2664_s3 }
0x155a   :  { %v794_v32 = vpop.permute.xlu0 %793 }
0x155b   :  { %796 = vst.msk [vmem:[#allocation2 + $0x8] sm:$0xc] %vm359_vm4, %v794_v32 }
0x155e   :  { %v1017_v33 = vld [vmem:[#allocation2] sm:$0xff] }
0x155f   :  { %2308 = vmatprep.mubr.msk.f32.mxu0 %vm147_vm3, %v1017_v33 }
0x15b0   :  { %v1188_v35 = vpop.f32.mrb[10].mxu1 }
0x15b1   :  { %v1189_v36 = vadd.f32 %v2975_v34, %v1188_v35  ;;  %v2321_v37 = vpop.f32.mrb[11].mxu1 }
0x15b3   :  { %1200 = vrot.lane.b32.xlu1 %v1189_v36, %s2663_s21 }
0x15c9   :  { %v1014_v38 = vpop.permute.xlu0 %1013 }
0x15ca   :  { %1016 = vst.msk [vmem:[#allocation2 + $0x8] sm:$0xc0] %vm581_vm5, %v1014_v38 }
0x15d1   :  { %v1018_v39 = vld [vmem:[#allocation2 + $0x8] sm:$0xff] }
0x15d2   :  { %2309 = vmatmul.mubr.msk.f32.vlgmr.msra.gmra.mrb[8].mxu0 %vm147_vm3, %v1018_v39 }
0x15d3   :  { %2486 = vmatpush3.bf16.msra.mxu0 %v2932_v14  ;;  %2330 = vmatprep.mubr.msk.f32.mxu0 %vm2661_vm0, %v2662_v8 }
0x15d4   :  { %2487 = vmatprep.subr.bf16.mxu0 %v2660_v3 }
0x15d7   :  { %2489 = vmatpush3.bf16.msra.mxu0 %v2938_v17 }
0x15d8   :  { %2496 = vmatprep.subr.bf16.mxu0 %v2660_v3 }
0x1625   :  { %v1201_v49 = vpop.permute.xlu1 %1200 }
0x16a5   :  { %v2310_v41 = vpop.f32.mrb[8].mxu0 }
0x16a6   :  { %v2990_v42 = vadd.f32 %v2310_v41, %v2077_v40  ;;  %v1102_v43 = vpop.f32.mrb[9].mxu0 }
0x16a7   :  { %v2992_v44 = vadd.f32 %v2077_v40, %v1102_v43 }
0x16a9   :  { %v1192_v45 = vadd.f32 %v1189_v36, %v2992_v44 }
0x16ab   :  { %v2081_v46 = vmul.f32 -1.442695, %v1192_v45 }
0x16ad   :  { %2586 = vpow2.f32 %v2081_v46 }
0x16b7   :  { %v2587_v47 = vpop.eup %2586 }
0x16b8   :  { %v1196_v48 = vadd.f32 1.0, %v2587_v47 }
0x16ba   :  { %2588 = vrcp.f32 %v1196_v48 }
0x16c4   :  { %v2589_v51 = vpop.eup %2588 }
0x16c5   :  { %v1203_v52 = vmul.f32 %v2589_v51, %v1201_v49  ;;  %v1210_v55 = vsub.f32 1.0, %v2589_v51  ;;  %v1216_v57 = vmul.f32 0.0, %v2589_v51 }
0x16c7   :  { %1205 = vrot.lane.b32.xlu0 %v1203_v52, %s2663_s21 }
0x1739   :  { %v1206_v27 = vpop.permute.xlu0 %1205 }
0x173a   :  { %v1208_v53 = vadd.f32 %v1206_v27, %v2992_v44 }
0x173c   :  { %2590 = vtanh.f32 %v1208_v53 }
0x1746   :  { %v2591_v54 = vpop.eup %2590 }
0x1747   :  { %1212 = vrot.lane.b32.xlu1 %v2591_v54, %s2664_s3 }
0x17b9   :  { %v1213_v56 = vpop.permute.xlu1 %1212 }
0x17ba   :  { %v1215_v58 = vmul.f32 %v1213_v56, %v1210_v55 }
0x17bc   :  { %v1217_v59 = vadd.f32 %v1216_v57, %v1215_v58 }
0x17be   :  { %1219 = vrot.lane.b32.xlu0 %v1217_v59, %s2664_s3  ;;  %v1319_v50 = vrot.slane %v1217_v59, 6 }
0x1830   :  { %v1220_v60 = vpop.permute.xlu0 %1219 }
0x1831   :  { %2331 = vmatmul.mubr.msk.f32.vlgmr.msra.gmra.mrb[10].mxu0 %vm147_vm3, %v1220_v60 }
0x1832   :  { %2498 = vmatpush3.bf16.msra.mxu0 %v2932_v14  ;;  %2352 = vmatprep.mubr.msk.f32.mxu0 %vm2661_vm0, %v2662_v8 }
0x1833   :  { %2499 = vmatprep.subr.bf16.mxu0 %v2660_v3 }
0x1836   :  { %2501 = vmatpush3.bf16.msra.mxu0 %v2938_v17 }
0x1837   :  { %2508 = vmatprep.subr.bf16.mxu0 %v2660_v3 }
0x1904   :  { %v1289_v61 = vpop.f32.mrb[10].mxu0 }
0x1905   :  { %v1290_v62 = vadd.f32 %v2975_v34, %v1289_v61  ;;  %v2332_v0 = vpop.f32.mrb[11].mxu0 }
0x1907   :  { %v1294_v1 = vrot.slane %v1290_v62, 6 }
0x1909   :  { %1303 = vrot.lane.b32.xlu1 %v1294_v1, %s2663_s21  ;;  %v1296_v2 = vadd.f32 %v1294_v1, %v2992_v44 }
0x190b   :  { %v2083_v4 = vmul.f32 -1.442695, %v1296_v2 }
0x190d   :  { %2592 = vpow2.f32 %v2083_v4 }
0x1917   :  { %v2593_v5 = vpop.eup %2592 }
0x1918   :  { %v1300_v6 = vadd.f32 1.0, %v2593_v5 }
0x191a   :  { %2594 = vrcp.f32 %v1300_v6 }
0x1924   :  { %v2595_v19 = vpop.eup %2594 }
0x1925   :  { %v1313_v25 = vsub.f32 1.0, %v2595_v19  ;;  %v1321_v28 = vmul.f32 %v2595_v19, %v1319_v50 }
0x197b   :  { %v1304_v7 = vpop.permute.xlu1 %1303 }
0x197c   :  { %v1306_v10 = vmul.f32 %v2595_v19, %v1304_v7 }
0x197e   :  { %1308 = vrot.lane.b32.xlu0 %v1306_v10, %s2663_s21 }
0x19f0   :  { %v1309_v11 = vpop.permute.xlu0 %1308 }
0x19f1   :  { %v1311_v63 = vadd.f32 %v1309_v11, %v2992_v44 }
0x19f3   :  { %2596 = vtanh.f32 %v1311_v63 }
0x19fd   :  { %v2597_v12 = vpop.eup %2596 }
0x19fe   :  { %1315 = vrot.lane.b32.xlu1 %v2597_v12, %s2664_s3 }
0x1a70   :  { %v1316_v13 = vpop.permute.xlu1 %1315 }
0x1a71   :  { %v1318_v15 = vmul.f32 %v1316_v13, %v1313_v25 }
0x1a73   :  { %v1322_v9 = vadd.f32 %v1321_v28, %v1318_v15 }
0x1a75   :  { %v1324_v18 = vrot.slane %v1322_v9, 2  ;;  %v1425_v38 = vrot.slane %v1322_v9, 6 }
0x1a77   :  { %1325 = vrot.lane.b32.xlu0 %v1324_v18, %s2664_s3 }
0x1ae9   :  { %v1326_v20 = vpop.permute.xlu0 %1325 }
0x1aea   :  { %2342 = vmatmul.mubr.msk.f32.vlgmr.msra.gmra.mrb[12].mxu1 %vm147_vm3, %v1326_v20 }
0x1aeb   :  { %2504 = vmatpush3.bf16.msra.mxu1 %v2932_v14  ;;  %2363 = vmatprep.mubr.msk.f32.mxu1 %vm2661_vm0, %v2662_v8 }
0x1aec   :  { %2505 = vmatprep.subr.bf16.mxu1 %v2660_v3 }
0x1aef   :  { %2507 = vmatpush3.bf16.msra.mxu1 %v2938_v17 }
0x1af0   :  { %2514 = vmatprep.subr.bf16.mxu1 %v2660_v3 }
0x1bbd   :  { %v1395_v21 = vpop.f32.mrb[12].mxu1 }
0x1bbe   :  { %v1396_v22 = vadd.f32 %v2975_v34, %v1395_v21  ;;  %v2343_v16 = vpop.f32.mrb[13].mxu1 }
0x1bc0   :  { %v1400_v23 = vrot.slane %v1396_v22, 4 }
0x1bc2   :  { %1409 = vrot.lane.b32.xlu1 %v1400_v23, %s2663_s21  ;;  %v1402_v24 = vadd.f32 %v1400_v23, %v2992_v44 }
0x1bc4   :  { %v2085_v26 = vmul.f32 -1.442695, %v1402_v24 }
0x1bc6   :  { %2598 = vpow2.f32 %v2085_v26 }
0x1bd0   :  { %v2599_v29 = vpop.eup %2598 }
0x1bd1   :  { %v1406_v30 = vadd.f32 1.0, %v2599_v29 }
0x1bd3   :  { %2600 = vrcp.f32 %v1406_v30 }
0x1bdd   :  { %v2601_v31 = vpop.eup %2600 }
0x1bde   :  { %v1419_v39 = vsub.f32 1.0, %v2601_v31  ;;  %v1427_v41 = vmul.f32 %v2601_v31, %v1425_v38 }
0x1c34   :  { %v1410_v32 = vpop.permute.xlu1 %1409 }
0x1c35   :  { %v1412_v33 = vmul.f32 %v2601_v31, %v1410_v32 }
0x1c37   :  { %1414 = vrot.lane.b32.xlu0 %v1412_v33, %s2663_s21 }
0x1ca9   :  { %v1415_v35 = vpop.permute.xlu0 %1414 }
0x1caa   :  { %v1417_v36 = vadd.f32 %v1415_v35, %v2992_v44 }
0x1cac   :  { %2602 = vtanh.f32 %v1417_v36 }
0x1cb6   :  { %v2603_v37 = vpop.eup %2602 }
0x1cb7   :  { %1421 = vrot.lane.b32.xlu1 %v2603_v37, %s2664_s3 }
0x1d29   :  { %v1422_v40 = vpop.permute.xlu1 %1421 }
0x1d2a   :  { %v1424_v43 = vmul.f32 %v1422_v40, %v1419_v39 }
0x1d2c   :  { %v1428_v45 = vadd.f32 %v1427_v41, %v1424_v43 }
0x1d2e   :  { %v1430_v46 = vrot.slane %v1428_v45, 4  ;;  %v1531_v62 = vrot.slane %v1428_v45, 6 }
0x1d30   :  { %1431 = vrot.lane.b32.xlu0 %v1430_v46, %s2664_s3 }
0x1da2   :  { %v1432_v47 = vpop.permute.xlu0 %1431 }
0x1da3   :  { %2353 = vmatmul.mubr.msk.f32.vlgmr.msra.gmra.mrb[12].mxu0 %vm147_vm3, %v1432_v47 }
0x1da4   :  { %2510 = vmatpush3.bf16.msra.mxu0 %v2932_v14  ;;  %2374 = vmatprep.mubr.msk.f32.mxu0 %vm2661_vm0, %v2662_v8 }
0x1da5   :  { %2511 = vmatprep.subr.bf16.mxu0 %v2660_v3 }
0x1da8   :  { %2513 = vmatpush3.bf16.msra.mxu0 %v2938_v17 }
0x1da9   :  { %2520 = vmatprep.subr.bf16.mxu0 %v2660_v3 }
0x1e76   :  { %v1501_v48 = vpop.f32.mrb[12].mxu0 }
0x1e77   :  { %v1502_v49 = vadd.f32 %v2975_v34, %v1501_v48  ;;  %v2354_v51 = vpop.f32.mrb[13].mxu0 }
0x1e79   :  { %v1506_v52 = vrot.slane %v1502_v49, 2 }
0x1e7b   :  { %1515 = vrot.lane.b32.xlu1 %v1506_v52, %s2663_s21  ;;  %v1508_v27 = vadd.f32 %v1506_v52, %v2992_v44 }
0x1e7d   :  { %v2087_v53 = vmul.f32 -1.442695, %v1508_v27 }
0x1e7f   :  { %2604 = vpow2.f32 %v2087_v53 }
0x1e89   :  { %v2605_v54 = vpop.eup %2604 }
0x1e8a   :  { %v1512_v55 = vadd.f32 1.0, %v2605_v54 }
0x1e8c   :  { %2606 = vrcp.f32 %v1512_v55 }
0x1e96   :  { %v2607_v56 = vpop.eup %2606 }
0x1e97   :  { %v1525_v0 = vsub.f32 1.0, %v2607_v56  ;;  %v1533_v2 = vmul.f32 %v2607_v56, %v1531_v62 }
0x1eed   :  { %v1516_v57 = vpop.permute.xlu1 %1515 }
0x1eee   :  { %v1518_v58 = vmul.f32 %v2607_v56, %v1516_v57 }
0x1ef0   :  { %1520 = vrot.lane.b32.xlu0 %v1518_v58, %s2663_s21 }
0x1f62   :  { %v1521_v59 = vpop.permute.xlu0 %1520 }
0x1f63   :  { %v1523_v60 = vadd.f32 %v1521_v59, %v2992_v44 }
0x1f65   :  { %2608 = vtanh.f32 %v1523_v60 }
0x1f6f   :  { %v2609_v61 = vpop.eup %2608 }
0x1f70   :  { %1527 = vrot.lane.b32.xlu1 %v2609_v61, %s2664_s3 }
0x1fe2   :  { %v1528_v1 = vpop.permute.xlu1 %1527 }
0x1fe3   :  { %v1530_v4 = vmul.f32 %v1528_v1, %v1525_v0 }
0x1fe5   :  { %v1534_v5 = vadd.f32 %v1533_v2, %v1530_v4 }
0x1fe7   :  { %v1536_v6 = vrot.slane %v1534_v5, 6 }
0x1fe9   :  { %1537 = vrot.lane.b32.xlu0 %v1536_v6, %s2664_s3 }
0x205b   :  { %v1538_v19 = vpop.permute.xlu0 %1537 }
0x205c   :  { %2364 = vmatmul.mubr.msk.f32.vlgmr.msra.gmra.mrb[14].mxu1 %vm147_vm3, %v1538_v19 }
0x205d   :  { %2516 = vmatpush3.bf16.msra.mxu1 %v2932_v14  ;;  %2385 = vmatprep.mubr.msk.f32.mxu1 %vm2661_vm0, %v2662_v8 }
0x205e   :  { %2517 = vmatprep.subr.bf16.mxu1 %v2660_v3 }
0x2061   :  { %2519 = vmatpush3.bf16.msra.mxu1 %v2938_v17 }
0x2062   :  { %2526 = vmatprep.subr.bf16.mxu1 %v2660_v3 }
0x212f   :  { %v1607_v44 = vpop.f32.mrb[14].mxu1 }
0x2130   :  { %v1608_v7 = vadd.f32 %v2975_v34, %v1607_v44  ;;  %v2365_v10 = vpop.f32.mrb[15].mxu1 }
0x2132   :  { %1619 = vrot.lane.b32.xlu1 %v1608_v7, %s2663_s21  ;;  %v1611_v11 = vadd.f32 %v1608_v7, %v2990_v42 }
0x2134   :  { %v2089_v63 = vmul.f32 -1.442695, %v1611_v11 }
0x2136   :  { %2610 = vpow2.f32 %v2089_v63 }
0x2140   :  { %v2611_v12 = vpop.eup %2610 }
0x2141   :  { %v1615_v50 = vadd.f32 1.0, %v2611_v12 }
0x2143   :  { %2612 = vrcp.f32 %v1615_v50 }
0x214d   :  { %v2613_v25 = vpop.eup %2612 }
0x214e   :  { %v1629_v20 = vsub.f32 1.0, %v2613_v25  ;;  %v1636_v22 = vmul.f32 %v2613_v25, %v1536_v6 }
0x21a4   :  { %v1620_v13 = vpop.permute.xlu1 %1619 }
0x21a5   :  { %v1622_v15 = vmul.f32 %v2613_v25, %v1620_v13 }
0x21a7   :  { %1624 = vrot.lane.b32.xlu0 %v1622_v15, %s2663_s21 }
0x2219   :  { %v1625_v28 = vpop.permute.xlu0 %1624 }
0x221a   :  { %v1627_v9 = vadd.f32 %v1625_v28, %v2990_v42 }
0x221c   :  { %2614 = vtanh.f32 %v1627_v9 }
0x2226   :  { %v2615_v18 = vpop.eup %2614 }
0x2227   :  { %1631 = vrot.lane.b32.xlu1 %v2615_v18, %s2664_s3 }
0x2299   :  { %v1632_v21 = vpop.permute.xlu1 %1631 }
0x229a   :  { %v1634_v16 = vmul.f32 %v1632_v21, %v1629_v20 }
0x229c   :  { %v1637_v23 = vadd.f32 %v1636_v22, %v1634_v16  ;;  %v1956_v22 = vld [vmem:[%s3125_s9 + $0x8] sm:$0xff]  ;;  %v1957_v16 = vld [vmem:[%s3125_s9 + $0x10] sm:$0xff] }
0x229e   :  { %1639 = vrot.lane.b32.xlu0 %v1637_v23, %s2664_s3  ;;  %v1739_v41 = vrot.slane %v1637_v23, 6 }
0x2310   :  { %v1640_v24 = vpop.permute.xlu0 %1639 }
0x2311   :  { %2375 = vmatmul.mubr.msk.f32.vlgmr.msra.gmra.mrb[14].mxu0 %vm147_vm3, %v1640_v24  ;;  %v1958_v24 = vld [vmem:[%s3125_s9 + $0x18] sm:$0xff] }
0x2312   :  { %2522 = vmatpush3.bf16.msra.mxu0 %v2932_v14  ;;  %2396 = vmatprep.mubr.msk.f32.mxu0 %vm2661_vm0, %v2662_v8 }
0x2313   :  { %2523 = vmatprep.subr.bf16.mxu0 %v2660_v3 }
0x2316   :  { %2525 = vmatpush3.bf16.msra.mxu0 %v2938_v17 }
0x23e4   :  { %v1709_v26 = vpop.f32.mrb[14].mxu0 }
0x23e5   :  { %v1710_v29 = vadd.f32 %v2975_v34, %v1709_v26  ;;  %v2376_v30 = vpop.f32.mrb[15].mxu0 }
0x23e7   :  { %v1714_v31 = vrot.slane %v1710_v29, 6 }
0x23e9   :  { %1723 = vrot.lane.b32.xlu1 %v1714_v31, %s2663_s21  ;;  %v1716_v32 = vadd.f32 %v1714_v31, %v2990_v42 }
0x23eb   :  { %v2091_v33 = vmul.f32 -1.442695, %v1716_v32 }
0x23ed   :  { %2616 = vpow2.f32 %v2091_v33 }
0x23f7   :  { %v2617_v35 = vpop.eup %2616 }
0x23f8   :  { %v1720_v14 = vadd.f32 1.0, %v2617_v35 }
0x23fa   :  { %2618 = vrcp.f32 %v1720_v14 }
0x2404   :  { %v2619_v36 = vpop.eup %2618 }
0x2405   :  { %v1733_v43 = vsub.f32 1.0, %v2619_v36  ;;  %v1741_v47 = vmul.f32 %v2619_v36, %v1739_v41 }
0x245b   :  { %v1724_v37 = vpop.permute.xlu1 %1723 }
0x245c   :  { %v1726_v38 = vmul.f32 %v2619_v36, %v1724_v37 }
0x245e   :  { %1728 = vrot.lane.b32.xlu0 %v1726_v38, %s2663_s21 }
0x24d0   :  { %v1729_v17 = vpop.permute.xlu0 %1728 }
0x24d1   :  { %v1731_v39 = vadd.f32 %v1729_v17, %v2990_v42 }
0x24d3   :  { %2620 = vtanh.f32 %v1731_v39 }
0x24dd   :  { %v2621_v40 = vpop.eup %2620 }
0x24de   :  { %1735 = vrot.lane.b32.xlu1 %v2621_v40, %s2664_s3 }
0x2550   :  { %v1736_v45 = vpop.permute.xlu1 %1735 }
0x2551   :  { %v1738_v46 = vmul.f32 %v1736_v45, %v1733_v43 }
0x2553   :  { %v1742_v48 = vadd.f32 %v1741_v47, %v1738_v46 }
0x2555   :  { %v1744_v49 = vrot.slane %v1742_v48, 2  ;;  %v1845_v1 = vrot.slane %v1742_v48, 6 }
0x2557   :  { %1745 = vrot.lane.b32.xlu0 %v1744_v49, %s2664_s3 }
0x25c9   :  { %v1746_v51 = vpop.permute.xlu0 %1745 }
0x25ca   :  { %2386 = vmatmul.mubr.msk.f32.vlgmr.msra.gmra.mrb[16].mxu1 %vm147_vm3, %v1746_v51 }
0x25cb   :  { %2407 = vmatprep.mubr.msk.f32.mxu1 %vm2661_vm0, %v2662_v8 }
0x269d   :  { %v1815_v52 = vpop.f32.mrb[16].mxu1 }
0x269e   :  { %v1816_v27 = vadd.f32 %v2975_v34, %v1815_v52  ;;  %v2387_v53 = vpop.f32.mrb[17].mxu1 }
0x26a0   :  { %v1820_v54 = vrot.slane %v1816_v27, 4 }
0x26a2   :  { %1829 = vrot.lane.b32.xlu1 %v1820_v54, %s2663_s21  ;;  %v1822_v55 = vadd.f32 %v1820_v54, %v2990_v42 }
0x26a4   :  { %v2093_v56 = vmul.f32 -1.442695, %v1822_v55 }
0x26a6   :  { %2622 = vpow2.f32 %v2093_v56 }
0x26b0   :  { %v2623_v57 = vpop.eup %2622 }
0x26b1   :  { %v1826_v58 = vadd.f32 1.0, %v2623_v57 }
0x26b3   :  { %2624 = vrcp.f32 %v1826_v58 }
0x26bd   :  { %v2625_v59 = vpop.eup %2624 }
0x26be   :  { %v1839_v2 = vsub.f32 1.0, %v2625_v59  ;;  %v1847_v5 = vmul.f32 %v2625_v59, %v1845_v1 }
0x2714   :  { %v1830_v60 = vpop.permute.xlu1 %1829 }
0x2715   :  { %v1832_v61 = vmul.f32 %v2625_v59, %v1830_v60 }
0x2717   :  { %1834 = vrot.lane.b32.xlu0 %v1832_v61, %s2663_s21 }
0x2789   :  { %v1835_v8 = vpop.permute.xlu0 %1834 }
0x278a   :  { %v1837_v62 = vadd.f32 %v1835_v8, %v2990_v42 }
0x278c   :  { %2626 = vtanh.f32 %v1837_v62 }
0x2796   :  { %v2627_v0 = vpop.eup %2626 }
0x2797   :  { %1841 = vrot.lane.b32.xlu1 %v2627_v0, %s2664_s3 }
0x2809   :  { %v1842_v4 = vpop.permute.xlu1 %1841 }
0x280a   :  { %v1844_v6 = vmul.f32 %v1842_v4, %v1839_v2 }
0x280c   :  { %v1848_v19 = vadd.f32 %v1847_v5, %v1844_v6 }
0x280e   :  { %v1850_v44 = vrot.slane %v1848_v19, 4  ;;  %v1951_v29 = vrot.slane %v1848_v19, 6 }
0x2810   :  { %1851 = vrot.lane.b32.xlu0 %v1850_v44, %s2664_s3 }
0x2882   :  { %v1852_v7 = vpop.permute.xlu0 %1851 }
0x2883   :  { %2397 = vmatmul.mubr.msk.f32.vlgmr.msra.gmra.mrb[16].mxu0 %vm147_vm3, %v1852_v7 }
0x2956   :  { %v1921_v10 = vpop.f32.mrb[16].mxu0 }
0x2957   :  { %v1922_v11 = vadd.f32 %v2975_v34, %v1921_v10  ;;  %v2398_v63 = vpop.f32.mrb[17].mxu0  ;;  %v1955_v34 = vld [vmem:[%s3125_s9] sm:$0xff] }
0x2958   :  { %v2527_v23 = vpack.c.bf16 %v1956_v22, %v1955_v34 }
0x2959   :  { %v1926_v12 = vrot.slane %v1922_v11, 2 }
0x295a   :  { %2528 = vmatpush3.bf16.msra.mxu1 %v2527_v23 }
0x295b   :  { %1935 = vrot.lane.b32.xlu1 %v1926_v12, %s2663_s21  ;;  %v1928_v50 = vadd.f32 %v1926_v12, %v2990_v42  ;;  %2529 = vmatprep.subr.bf16.mxu1 %v2660_v3  ;;  %v2096_v3 = vld [vmem:[%s3126_s10] ss:$0 sm:$0xff] }
0x295d   :  { %v2095_v25 = vmul.f32 -1.442695, %v1928_v50 }
0x295f   :  { %2628 = vpow2.f32 %v2095_v25 }
0x2969   :  { %v2629_v13 = vpop.eup %2628 }
0x296a   :  { %v1932_v15 = vadd.f32 1.0, %v2629_v13 }
0x296c   :  { %2630 = vrcp.f32 %v1932_v15 }
0x2976   :  { %v2631_v28 = vpop.eup %2630 }
0x2977   :  { %v1945_v30 = vsub.f32 1.0, %v2631_v28  ;;  %v1953_v32 = vmul.f32 %v2631_v28, %v1951_v29 }
0x29cd   :  { %v1936_v9 = vpop.permute.xlu1 %1935 }
0x29ce   :  { %v1938_v18 = vmul.f32 %v2631_v28, %v1936_v9 }
0x29d0   :  { %1940 = vrot.lane.b32.xlu0 %v1938_v18, %s2663_s21 }
0x2a42   :  { %v1941_v20 = vpop.permute.xlu0 %1940 }
0x2a43   :  { %v1943_v21 = vadd.f32 %v1941_v20, %v2990_v42  ;;  %v2530_v42 = vpack.c.bf16 %v1958_v24, %v1957_v16 }
0x2a45   :  { %2632 = vtanh.f32 %v1943_v21  ;;  %2531 = vmatpush3.bf16.msra.mxu1 %v2530_v42 }
0x2a4f   :  { %v2633_v26 = vpop.eup %2632 }
0x2a50   :  { %1947 = vrot.lane.b32.xlu1 %v2633_v26, %s2664_s3 }
0x2ac2   :  { %v1948_v31 = vpop.permute.xlu1 %1947 }
0x2ac3   :  { %v1950_v33 = vmul.f32 %v1948_v31, %v1945_v30 }
0x2ac5   :  { %v1954_v35 = vadd.f32 %v1953_v32, %v1950_v33 }
0x2ac7   :  { %v1967_v14 = vrot.slane %v1954_v35, 6 }
0x2ac9   :  { %1968 = vrot.lane.b32.xlu0 %v1967_v14, %s2664_s3 }
0x2b3b   :  { %v1969_v36 = vpop.permute.xlu0 %1968 }
0x2b3c   :  { %2408 = vmatmul.mubr.msk.f32.vlgmr.msra.gmra.mrb[18].mxu1 %vm147_vm3, %v1969_v36 }
0x2c0f   :  { %v2038_v37 = vpop.f32.mrb[18].mxu1 }
0x2c10   :  { %v2039_v38 = vadd.f32 %v2096_v3, %v2038_v37  ;;  %v2409_v17 = vpop.f32.mrb[19].mxu1 }
0x2c12   :  { %2634 = vtanh.f32 %v2039_v38 }
0x2c1c   :  { %v2635_v39 = vpop.eup %2634 }
0x2c1d   :  { %2043 = vst.msk [vmem:[#allocation3] sm:$0x3] %vm251_vm2, %v2635_v39 }
0x2c1e   :  { %2647 = shalt.err (!%p2644_p4)
}
0x2c1f   :  { %s2648_s10 = scalar_lea.hbm %s3127_s11, 32 }
0x2c20   :  { %p2649_p5 = scmp.ne.s32.totalorder %s3127_s11, %s2648_s10  ;;  %p2652_p6 = scmp.lt.u32.totalorder %s2648_s10, %s3127_s11 }
0x2c22   :  { %p2654_p7 = pnand %p2652_p6, %p2649_p5 }
0x2c24   :  { %2657 = shalt.err (!%p2654_p7)
}
0x2c25   :  { %2053 = dma.vmem_to_hbm [thread:$0]  %s2051_s26, 32, %s3127_s11, [#allocation4]  }
0x2c26   :  { %2658 = dma.done.wait [#allocation4], 32  }
0x2c27   :  { %2659 = vsyncadd [#allocation4], 4294967264 }
0x2c28   :  { %2057 = vsyncpa [#allocation4], 1 }

</bundles_post_ra>
